<compile_context>
chip_gen: v7x
topology: tpu7x:2x2x1
jax: 0.10.0
libtpu: 0.0.40
codegen_flags: <defaults>
</compile_context>

<pallas_src>
import jax
import jax.numpy as jnp
from jax import lax
from jax.experimental import pallas as pl
from jax.experimental.pallas import tpu as pltpu

EPS = 1e-5  # MambaRMSNorm eps
VMEM_LIMIT = 32 * 1024 * 1024


def _silu(z):
    return z * (1.0 / (1.0 + jnp.exp(-z)))


def _softplus(z):
    return jnp.maximum(z, 0.0) + jnp.log(1.0 + jnp.exp(-jnp.abs(z)))


def _rmsnorm(x, w):
    var = jnp.mean(x * x, axis=-1, keepdims=True)
    return x * lax.rsqrt(var + EPS) * w


def _round_up(x, m):
    return ((x + m - 1) // m) * m


# ----------------------------------------------------------------------------
# Kernel 1: fused embedding-add + ALL Mamba blocks.
# grid = (B, n_layers); h stays resident in VMEM across the layer axis.
# ----------------------------------------------------------------------------
def stack_kernel(tok_ref, t_ref, tw_ref, tb_ref,
                 normw_ref, wx_ref, wg_ref, convw_ref, vecs_ref,
                 xpw_ref, dtw_ref, alog_ref, outw_ref,
                 h_ref,
                 pad_scr, da_scr, dbu_scr, cm_scr, y_scr):
    L = tok_ref.shape[1]
    DI = vecs_ref.shape[2]
    K = convw_ref.shape[1]
    N = alog_ref.shape[1]
    LC = dbu_scr.shape[0]
    DTP = dtw_ref.shape[1]           # padded dt_rank (128-multiple)
    XPW = xpw_ref.shape[2]           # fused x_proj width = DTP + 2*NP
    NP = (XPW - DTP) // 2            # padded state width (128-multiple)

    layer = pl.program_id(1)

    # layer 0: build embs = token_embedding + Linear(1->H)(times)
    @pl.when(layer == 0)
    def _():
        h_ref[0] = tok_ref[0] + t_ref[0] * tw_ref[...] + tb_ref[...]

    h = h_ref[0]                                        # (L, H) f32, VMEM-resident
    hn = _rmsnorm(h, normw_ref[0])
    hn16 = hn.astype(jnp.bfloat16)

    # in_proj with split (lane-aligned) x / gate weights
    x = jnp.dot(hn16, wx_ref[0], preferred_element_type=jnp.float32)     # (L, DI)
    gate = jnp.dot(hn16, wg_ref[0], preferred_element_type=jnp.float32)  # (L, DI)

    # packed per-layer vectors: conv bias / dt bias / D skip
    vr = vecs_ref[0]                                    # (3, DI)
    conv_b = vr[0:1]
    dt_b = vr[1:2]
    dvec = vr[2:3]

    # depthwise causal conv1d: only the K-1 halo rows need zeroing,
    # the L body rows are overwritten by x (saves an (L,DI) store).
    pad_scr[pl.ds(0, K - 1), :] = jnp.zeros((K - 1, DI), jnp.float32)
    pad_scr[pl.ds(K - 1, L), :] = x
    cw = convw_ref[0]                                   # (K, DI)
    acc = jnp.zeros((L, DI), jnp.float32)
    for k in range(K):                                  # K = 4, static taps
        acc = acc + pad_scr[pl.ds(k, L), :] * cw[k]
    u = _silu(acc + conv_b)                             # (L, DI) f32
    u16 = u.astype(jnp.bfloat16)

    # fused x_proj: one MXU pass; dt / B / C sub-blocks are 128-lane aligned
    xp = jnp.dot(u16, xpw_ref[0], preferred_element_type=jnp.float32)    # (L, XPW)
    dt_in = xp[:, :DTP]                                 # padded cols are exact zeros
    Bm = xp[:, DTP:DTP + N]                             # (L, N)
    Cm = xp[:, DTP + NP:DTP + NP + N]                   # (L, N)
    cm_scr[...] = Cm                                    # per-step dynamic reads below

    dt = _softplus(jnp.dot(dt_in.astype(jnp.bfloat16), dtw_ref[0],
                           preferred_element_type=jnp.float32)
                   + dt_b)                              # (L, DI) f32

    A2 = -jnp.exp(alog_ref[0])                          # (N, DI): DI on lanes
    du = dt * u                                         # (L, DI)

    # chunked selective scan: state (N, DI), DI on the lane axis.
    # dA is precomputed per chunk (vectorized EUP) so the serial loop is a
    # pure FMA chain; y is reduced in-loop (off the recurrence path).
    state = jnp.zeros((N, DI), jnp.float32)
    for c in range(L // LC):
        r0 = c * LC
        dt_c = dt[r0:r0 + LC]                                           # (LC, DI)
        da_scr[...] = jnp.exp(dt_c[:, None, :] * A2[None, :, :])        # (LC, N, DI)
        dbu_scr[...] = Bm[r0:r0 + LC, :, None] * du[r0:r0 + LC, None, :]

        def body(t, st, r0=r0):
            st = da_scr[t] * st + dbu_scr[t]            # (N, DI) FMA only
            c_row = cm_scr[pl.ds(r0 + t, 1), :]         # (1, N)
            y_scr[pl.ds(r0 + t, 1), :] = jnp.dot(       # (1,N)x(N,DI) -> (1,DI)
                c_row, st, preferred_element_type=jnp.float32)
            return st

        state = lax.fori_loop(0, LC, body, state, unroll=min(LC, 8))

    y = y_scr[...]                                      # (L, DI)
    y = y + u * dvec                                    # D skip connection
    y = y * _silu(gate)                                 # gating
    out = jnp.dot(y.astype(jnp.bfloat16), outw_ref[0],
                  preferred_element_type=jnp.float32)   # (L, H)
    h_ref[0] = h + out                                  # residual (stays in VMEM)


# ----------------------------------------------------------------------------
# Kernel 2: final RMSNorm + tied lm_head, vocab axis tiled.
# RMSNorm + bf16 cast done once per batch element, cached across vocab tiles.
# ----------------------------------------------------------------------------
def head_kernel(h_ref, normw_ref, w_ref, o_ref, hn_scr):
    @pl.when(pl.program_id(1) == 0)
    def _():
        hn_scr[...] = _rmsnorm(h_ref[0], normw_ref[...]).astype(jnp.bfloat16)
    o_ref[0] = jnp.dot(hn_scr[...], w_ref[...], preferred_element_type=jnp.float32)


# ----------------------------------------------------------------------------
# Wrapper
# ----------------------------------------------------------------------------
def _choose_vocab_tile(vocab):
    for tv in (512, 256, 128):
        if vocab % tv == 0:
            return tv
    return vocab  # fallback: whole vocab in one block (small-vocab toy config)


def mamba_forward(params, input_ids, times):
    B, L = input_ids.shape
    V, H = params["embed"].shape
    NL = params["norm_w"].shape[0]
    DI = params["vecs"].shape[-1]
    K = params["conv_w"].shape[1]
    N = params["A_log"].shape[1]

    LC = L if L <= 64 else 64                           # scan chunk length
    assert L % LC == 0

    # Token embedding gather done by XLA (O(L*H) bytes); time-linear add is
    # fused into the layer-stack kernel at layer == 0.
    tok = jnp.take(params["embed"], input_ids.astype(jnp.int32), axis=0)  # (B,L,H)
    t3 = times.astype(jnp.float32).reshape(B, L, 1)

    def _bcast(shape):       # whole array, constant over the (b, l) grid
        nd = len(shape)
        return pl.BlockSpec(shape, lambda b, l, _nd=nd: (0,) * _nd)

    def _per_layer(shape):   # leading layer axis selected by l
        nd = len(shape)
        return pl.BlockSpec((1,) + tuple(shape[1:]),
                            lambda b, l, _nd=nd: (l,) + (0,) * (_nd - 1))

    h = pl.pallas_call(
        stack_kernel,
        out_shape=jax.ShapeDtypeStruct((B, L, H), jnp.float32),
        grid=(B, NL),
        in_specs=[
            pl.BlockSpec((1, L, H), lambda b, l: (b, 0, 0)),   # token embeddings
            pl.BlockSpec((1, L, 1), lambda b, l: (b, 0, 0)),   # times
            _bcast(params["time_w"].shape),
            _bcast(params["time_b"].shape),
            _per_layer(params["norm_w"].shape),
            _per_layer(params["in_proj_x"].shape),
            _per_layer(params["in_proj_g"].shape),
            _per_layer(params["conv_w"].shape),
            _per_layer(params["vecs"].shape),
            _per_layer(params["x_proj"].shape),
            _per_layer(params["dt_w"].shape),
            _per_layer(params["A_log"].shape),
            _per_layer(params["out_proj"].shape),
        ],
        out_specs=pl.BlockSpec((1, L, H), lambda b, l: (b, 0, 0)),
        scratch_shapes=[
            pltpu.VMEM((L + K - 1, DI), jnp.float32),   # padded conv buffer
            pltpu.VMEM((LC, N, DI), jnp.float32),       # per-chunk dA = exp(dt*A)
            pltpu.VMEM((LC, N, DI), jnp.float32),       # per-chunk dBu
            pltpu.VMEM((L, N), jnp.float32),            # C (per-step rows)
            pltpu.VMEM((L, DI), jnp.float32),           # scan outputs y
        ],
        compiler_params=pltpu.CompilerParams(
            dimension_semantics=("parallel", "arbitrary"),
            vmem_limit_bytes=VMEM_LIMIT),
    )(tok, t3, params["time_w"], params["time_b"],
      params["norm_w"], params["in_proj_x"], params["in_proj_g"],
      params["conv_w"], params["vecs"],
      params["x_proj"], params["dt_w"], params["A_log"], params["out_proj"])

    TV = _choose_vocab_tile(V)
    logits = pl.pallas_call(
        head_kernel,
        out_shape=jax.ShapeDtypeStruct((B, L, V), jnp.float32),
        grid=(B, V // TV),
        in_specs=[
            pl.BlockSpec((1, L, H), lambda b, v: (b, 0, 0)),
            pl.BlockSpec((1, H), lambda b, v: (0, 0)),
            pl.BlockSpec((H, TV), lambda b, v: (0, v)),
        ],
        out_specs=pl.BlockSpec((1, L, TV), lambda b, v: (b, 0, v)),
        scratch_shapes=[pltpu.VMEM((L, H), jnp.bfloat16)],   # cached RMSNorm(h)
        compiler_params=pltpu.CompilerParams(
            dimension_semantics=("parallel", "arbitrary"),
            vmem_limit_bytes=VMEM_LIMIT),
    )(h, params["norm_f_w"], params["lm_head"])
    return logits


# ----------------------------------------------------------------------------
# Deterministic synthetic parameter init (shapes follow the HF Mamba config);
# per-layer weights stacked along a leading n_layers axis, MXU weights in bf16.
# x_proj is fused/padded (dt|B|C on 128-lane boundaries); dt_proj rows padded
# to match; conv_b / dt_b / D packed into one (n_layers, 3, d_inner) array.
# ----------------------------------------------------------------------------
def init_params(key, vocab=64, hidden=32, n_layers=2, state=8, conv_k=4):
    d_inner = 2 * hidden
    dt_rank = max(1, hidden // 16)
    dtp = _round_up(dt_rank, 128)
    np_ = _round_up(state, 128)
    keys = list(jax.random.split(key, 16))
    ki = iter(keys)

    def nrm(shape, scale=0.02, dtype=jnp.float32):
        return (scale * jax.random.normal(next(ki), shape)).astype(dtype)

    embed = nrm((vocab, hidden))                                   # f32 (V, H)

    # fused x_proj weight: [dt | B | C], each segment padded to 128 lanes
    xw_dt = nrm((n_layers, d_inner, dt_rank))
    xw_B = nrm((n_layers, d_inner, state))
    xw_C = nrm((n_layers, d_inner, state))
    x_proj = jnp.zeros((n_layers, d_inner, dtp + 2 * np_), jnp.float32)
    x_proj = x_proj.at[:, :, :dt_rank].set(xw_dt)
    x_proj = x_proj.at[:, :, dtp:dtp + state].set(xw_B)
    x_proj = x_proj.at[:, :, dtp + np_:dtp + np_ + state].set(xw_C)

    # dt_proj weight with rows padded to the same 128-boundary
    dt_w_raw = nrm((n_layers, dt_rank, d_inner), 0.1)
    dt_w = jnp.zeros((n_layers, dtp, d_inner), jnp.float32)
    dt_w = dt_w.at[:, :dt_rank, :].set(dt_w_raw)

    # A_log stored transposed (N, DI) relative to HF's (DI, N) -- internally
    # consistent; any checkpoint-loading path must transpose.
    a_log_t = jnp.broadcast_to(
        jnp.log(jnp.arange(1, state + 1, dtype=jnp.float32))[:, None],
        (state, d_inner))

    conv_b = jnp.zeros((n_layers, 1, d_inner), jnp.float32)
    dt_b = jnp.full((n_layers, 1, d_inner), -2.0, jnp.float32)
    d_skip = jnp.ones((n_layers, 1, d_inner), jnp.float32)

    params = {
        "embed": embed,
        "lm_head": embed.T.astype(jnp.bfloat16),                   # tied, transposed ONCE
        "time_w": nrm((1, hidden)),                                # Linear(1,H).weight.T
        "time_b": jnp.zeros((1, hidden), jnp.float32),
        "norm_f_w": jnp.ones((1, hidden), jnp.float32),
        "norm_w": jnp.ones((n_layers, 1, hidden), jnp.float32),
        "in_proj_x": nrm((n_layers, hidden, d_inner), dtype=jnp.bfloat16),
        "in_proj_g": nrm((n_layers, hidden, d_inner), dtype=jnp.bfloat16),
        "conv_w": nrm((n_layers, conv_k, d_inner), 0.1),           # depthwise (K, DI)
        "vecs": jnp.concatenate([conv_b, dt_b, d_skip], axis=1),   # (NL, 3, DI)
        "x_proj": x_proj.astype(jnp.bfloat16),                     # (NL, DI, DTP+2*NP)
        "dt_w": dt_w.astype(jnp.bfloat16),                         # (NL, DTP, DI)
        "A_log": jnp.broadcast_to(a_log_t[None], (n_layers, state, d_inner)
                                  ).astype(jnp.float32),
        "D": d_skip,                                               # kept for reference
        "out_proj": nrm((n_layers, d_inner, hidden), dtype=jnp.bfloat16),
    }
    return params


if __name__ == "__main__":
    B, L = 2, 8
    VOCAB, HIDDEN, N_LAYERS = 64, 32, 2

    key = jax.random.PRNGKey(0)
    k_ids, k_times, k_params = jax.random.split(key, 3)
    input_ids = jax.random.randint(k_ids, (B, L), 0, VOCAB, dtype=jnp.int32)
    times = jax.random.uniform(k_times, (B, L), dtype=jnp.float32)
    params = init_params(k_params, vocab=VOCAB, hidden=HIDDEN, n_layers=N_LAYERS)

    logits = mamba_forward(params, input_ids, times)
    jax.block_until_ready(logits)

    assert logits.shape == (B, L, VOCAB), logits.shape
    assert bool(jnp.all(jnp.isfinite(logits)))
    print("KERNEL_OK")
</pallas_src>

<mosaic_0001>
module attributes {stable_mosaic.version = 11 : i64} {
  func.func @stack_kernel(%arg0: i32, %arg1: i32, %arg2: memref<1x8x32xf32, #tpu.memory_space<vmem>>, %arg3: memref<1x8x1xf32, #tpu.memory_space<vmem>>, %arg4: memref<1x32xf32, #tpu.memory_space<vmem>>, %arg5: memref<1x32xf32, #tpu.memory_space<vmem>>, %arg6: memref<1x1x32xf32, #tpu.memory_space<vmem>>, %arg7: memref<1x32x64xbf16, #tpu.memory_space<vmem>>, %arg8: memref<1x32x64xbf16, #tpu.memory_space<vmem>>, %arg9: memref<1x4x64xf32, #tpu.memory_space<vmem>>, %arg10: memref<1x3x64xf32, #tpu.memory_space<vmem>>, %arg11: memref<1x64x384xbf16, #tpu.memory_space<vmem>>, %arg12: memref<1x128x64xbf16, #tpu.memory_space<vmem>>, %arg13: memref<1x8x64xf32, #tpu.memory_space<vmem>>, %arg14: memref<1x64x32xbf16, #tpu.memory_space<vmem>>, %arg15: memref<1x8x32xf32, #tpu.memory_space<vmem>>, %arg16: memref<11x64xf32, #tpu.memory_space<vmem>>, %arg17: memref<8x8x64xf32, #tpu.memory_space<vmem>>, %arg18: memref<8x8x64xf32, #tpu.memory_space<vmem>>, %arg19: memref<8x8xf32, #tpu.memory_space<vmem>>, %arg20: memref<8x64xf32, #tpu.memory_space<vmem>>) attributes {dimension_semantics = [#tpu.dimension_semantics<parallel>, #tpu.dimension_semantics<arbitrary>], iteration_bounds = array<i64: 2, 2>, scalar_prefetch = 0 : i64, scratch_operands = 5 : i64, tpu.core_type = #tpu.core_type<tc>, window_params = [{transform_indices = @transform_0, window_bounds = array<i64: 1, 8, 32>}, {transform_indices = @transform_1, window_bounds = array<i64: 1, 8, 1>}, {pipeline_mode = #tpu.pipeline_mode<synchronous>, transform_indices = @transform_2, window_bounds = array<i64: 1, 32>}, {pipeline_mode = #tpu.pipeline_mode<synchronous>, transform_indices = @transform_3, window_bounds = array<i64: 1, 32>}, {transform_indices = @transform_4, window_bounds = array<i64: 1, 1, 32>}, {transform_indices = @transform_5, window_bounds = array<i64: 1, 32, 64>}, {transform_indices = @transform_6, window_bounds = array<i64: 1, 32, 64>}, {transform_indices = @transform_7, window_bounds = array<i64: 1, 4, 64>}, {transform_indices = @transform_8, window_bounds = array<i64: 1, 3, 64>}, {transform_indices = @transform_9, window_bounds = array<i64: 1, 64, 384>}, {transform_indices = @transform_10, window_bounds = array<i64: 1, 128, 64>}, {transform_indices = @transform_11, window_bounds = array<i64: 1, 8, 64>}, {transform_indices = @transform_12, window_bounds = array<i64: 1, 64, 32>}, {transform_indices = @transform_13, window_bounds = array<i64: 1, 8, 32>}]} {
    %c0_i32 = arith.constant 0 : i32
    %0 = arith.cmpi eq, %arg1, %c0_i32 : i32
    %1 = arith.extui %0 : i1 to i32
    %c0_i32_0 = arith.constant 0 : i32
    %2 = arith.cmpi ne, %1, %c0_i32_0 : i32
    scf.if %2 {
      %c0_145 = arith.constant 0 : index
      %c0_146 = arith.constant 0 : index
      %c0_147 = arith.constant 0 : index
      %260 = vector.load %arg2[%c0_145, %c0_146, %c0_147] : memref<1x8x32xf32, #tpu.memory_space<vmem>>, vector<1x8x32xf32>
      %261 = vector.shape_cast %260 : vector<1x8x32xf32> to vector<8x32xf32>
      %c0_148 = arith.constant 0 : index
      %c0_149 = arith.constant 0 : index
      %c0_150 = arith.constant 0 : index
      %262 = vector.load %arg3[%c0_148, %c0_149, %c0_150] : memref<1x8x1xf32, #tpu.memory_space<vmem>>, vector<1x8x1xf32>
      %263 = vector.shape_cast %262 : vector<1x8x1xf32> to vector<8x1xf32>
      %c0_151 = arith.constant 0 : index
      %c0_152 = arith.constant 0 : index
      %264 = vector.load %arg4[%c0_151, %c0_152] : memref<1x32xf32, #tpu.memory_space<vmem>>, vector<1x32xf32>
      %265 = vector.broadcast %263 : vector<8x1xf32> to vector<8x32xf32>
      %266 = vector.broadcast %264 : vector<1x32xf32> to vector<8x32xf32>
      %267 = arith.mulf %265, %266 : vector<8x32xf32>
      %268 = arith.addf %261, %267 : vector<8x32xf32>
      %c0_153 = arith.constant 0 : index
      %c0_154 = arith.constant 0 : index
      %269 = vector.load %arg5[%c0_153, %c0_154] : memref<1x32xf32, #tpu.memory_space<vmem>>, vector<1x32xf32>
      %270 = vector.broadcast %269 : vector<1x32xf32> to vector<8x32xf32>
      %271 = arith.addf %268, %270 : vector<8x32xf32>
      %c0_155 = arith.constant 0 : index
      %c0_156 = arith.constant 0 : index
      %c0_157 = arith.constant 0 : index
      %272 = vector.load %arg15[%c0_155, %c0_156, %c0_157] : memref<1x8x32xf32, #tpu.memory_space<vmem>>, vector<1x8x32xf32>
      %273 = vector.shape_cast %272 : vector<1x8x32xf32> to vector<8x32xf32>
      %274 = vector.shape_cast %271 : vector<8x32xf32> to vector<1x8x32xf32>
      tpu.vector_store %arg15[%c0_155, %c0_156, %c0_157], %274 {strides = array<i32>} : memref<1x8x32xf32, #tpu.memory_space<vmem>>, vector<1x8x32xf32>,
    } else {
    }
    %c0 = arith.constant 0 : index
    %c0_1 = arith.constant 0 : index
    %c0_2 = arith.constant 0 : index
    %3 = vector.load %arg15[%c0, %c0_1, %c0_2] : memref<1x8x32xf32, #tpu.memory_space<vmem>>, vector<1x8x32xf32>
    %4 = vector.shape_cast %3 : vector<1x8x32xf32> to vector<8x32xf32>
    %c0_3 = arith.constant 0 : index
    %c0_4 = arith.constant 0 : index
    %c0_5 = arith.constant 0 : index
    %5 = vector.load %arg6[%c0_3, %c0_4, %c0_5] : memref<1x1x32xf32, #tpu.memory_space<vmem>>, vector<1x1x32xf32>
    %6 = vector.shape_cast %5 : vector<1x1x32xf32> to vector<1x32xf32>
    %7 = arith.mulf %4, %4 : vector<8x32xf32>
    %cst = arith.constant dense<0.000000e+00> : vector<8xf32>
    %8 = vector.multi_reduction <add>, %7, %cst [1] : vector<8x32xf32> to vector<8xf32>
    %9 = vector.shape_cast %8 : vector<8xf32> to vector<8x1xf32>
    %cst_6 = arith.constant 3.200000e+01 : f32
    %10 = vector.broadcast %cst_6 : f32 to vector<8x1xf32>
    %11 = arith.divf %9, %10 : vector<8x1xf32>
    %cst_7 = arith.constant 9.99999974E-6 : f32
    %12 = vector.broadcast %cst_7 : f32 to vector<8x1xf32>
    %13 = arith.addf %11, %12 : vector<8x1xf32>
    %14 = math.rsqrt %13 : vector<8x1xf32>
    %15 = vector.broadcast %14 : vector<8x1xf32> to vector<8x32xf32>
    %16 = arith.mulf %4, %15 : vector<8x32xf32>
    %17 = vector.broadcast %6 : vector<1x32xf32> to vector<8x32xf32>
    %18 = arith.mulf %16, %17 : vector<8x32xf32>
    %19 = arith.truncf %18 : vector<8x32xf32> to vector<8x32xbf16>
    %c0_8 = arith.constant 0 : index
    %c0_9 = arith.constant 0 : index
    %c0_10 = arith.constant 0 : index
    %20 = vector.load %arg7[%c0_8, %c0_9, %c0_10] : memref<1x32x64xbf16, #tpu.memory_space<vmem>>, vector<1x32x64xbf16>
    %21 = vector.shape_cast %20 : vector<1x32x64xbf16> to vector<32x64xbf16>
    %cst_11 = arith.constant dense<0.000000e+00> : vector<8x64xf32>
    %22 = tpu.matmul %19, %21, %cst_11 {dimension_numbers = #tpu.dot_dimension_numbers<[1], [0], [0], [1], [0, 0, 1, 1], [], []>} : vector<8x32xbf16>, vector<32x64xbf16>, vector<8x64xf32> -> vector<8x64xf32>
    %c0_12 = arith.constant 0 : index
    %c0_13 = arith.constant 0 : index
    %c0_14 = arith.constant 0 : index
    %23 = vector.load %arg8[%c0_12, %c0_13, %c0_14] : memref<1x32x64xbf16, #tpu.memory_space<vmem>>, vector<1x32x64xbf16>
    %24 = vector.shape_cast %23 : vector<1x32x64xbf16> to vector<32x64xbf16>
    %cst_15 = arith.constant dense<0.000000e+00> : vector<8x64xf32>
    %25 = tpu.matmul %19, %24, %cst_15 {dimension_numbers = #tpu.dot_dimension_numbers<[1], [0], [0], [1], [0, 0, 1, 1], [], []>} : vector<8x32xbf16>, vector<32x64xbf16>, vector<8x64xf32> -> vector<8x64xf32>
    %c0_16 = arith.constant 0 : index
    %c0_17 = arith.constant 0 : index
    %c0_18 = arith.constant 0 : index
    %26 = vector.load %arg10[%c0_16, %c0_17, %c0_18] : memref<1x3x64xf32, #tpu.memory_space<vmem>>, vector<1x3x64xf32>
    %27 = vector.shape_cast %26 : vector<1x3x64xf32> to vector<3x64xf32>
    %28 = vector.extract_strided_slice %27 {offsets = [0, 0], sizes = [1, 64], strides = [1, 1]} : vector<3x64xf32> to vector<1x64xf32>
    %29 = vector.extract_strided_slice %27 {offsets = [1, 0], sizes = [1, 64], strides = [1, 1]} : vector<3x64xf32> to vector<1x64xf32>
    %30 = vector.extract_strided_slice %27 {offsets = [2, 0], sizes = [1, 64], strides = [1, 1]} : vector<3x64xf32> to vector<1x64xf32>
    %cst_19 = arith.constant 0.000000e+00 : f32
    %31 = vector.broadcast %cst_19 : f32 to vector<3x64xf32>
    %c0_20 = arith.constant 0 : index
    %c0_21 = arith.constant 0 : index
    %32 = vector.load %arg16[%c0_20, %c0_21] : memref<11x64xf32, #tpu.memory_space<vmem>>, vector<3x64xf32>
    tpu.vector_store %arg16[%c0_20, %c0_21], %31 {strides = array<i32>} : memref<11x64xf32, #tpu.memory_space<vmem>>, vector<3x64xf32>,
    %c3 = arith.constant 3 : index
    %c0_22 = arith.constant 0 : index
    %33 = vector.load %arg16[%c3, %c0_22] : memref<11x64xf32, #tpu.memory_space<vmem>>, vector<8x64xf32>
    tpu.vector_store %arg16[%c3, %c0_22], %22 {strides = array<i32>} : memref<11x64xf32, #tpu.memory_space<vmem>>, vector<8x64xf32>,
    %c0_23 = arith.constant 0 : index
    %c0_24 = arith.constant 0 : index
    %c0_25 = arith.constant 0 : index
    %34 = vector.load %arg9[%c0_23, %c0_24, %c0_25] : memref<1x4x64xf32, #tpu.memory_space<vmem>>, vector<1x4x64xf32>
    %35 = vector.shape_cast %34 : vector<1x4x64xf32> to vector<4x64xf32>
    %cst_26 = arith.constant 0.000000e+00 : f32
    %36 = vector.broadcast %cst_26 : f32 to vector<8x64xf32>
    %c0_27 = arith.constant 0 : index
    %c0_28 = arith.constant 0 : index
    %37 = vector.load %arg16[%c0_27, %c0_28] : memref<11x64xf32, #tpu.memory_space<vmem>>, vector<8x64xf32>
    %38 = vector.extract_strided_slice %35 {offsets = [0, 0], sizes = [1, 64], strides = [1, 1]} : vector<4x64xf32> to vector<1x64xf32>
    %39 = vector.shape_cast %38 : vector<1x64xf32> to vector<64xf32>
    %40 = vector.shape_cast %39 : vector<64xf32> to vector<1x64xf32>
    %41 = vector.broadcast %40 : vector<1x64xf32> to vector<8x64xf32>
    %42 = arith.mulf %37, %41 : vector<8x64xf32>
    %43 = arith.addf %36, %42 : vector<8x64xf32>
    %c1 = arith.constant 1 : index
    %c0_29 = arith.constant 0 : index
    %44 = vector.load %arg16[%c1, %c0_29] : memref<11x64xf32, #tpu.memory_space<vmem>>, vector<8x64xf32>
    %45 = vector.extract_strided_slice %35 {offsets = [1, 0], sizes = [1, 64], strides = [1, 1]} : vector<4x64xf32> to vector<1x64xf32>
    %46 = vector.shape_cast %45 : vector<1x64xf32> to vector<64xf32>
    %47 = vector.shape_cast %46 : vector<64xf32> to vector<1x64xf32>
    %48 = vector.broadcast %47 : vector<1x64xf32> to vector<8x64xf32>
    %49 = arith.mulf %44, %48 : vector<8x64xf32>
    %50 = arith.addf %43, %49 : vector<8x64xf32>
    %c2 = arith.constant 2 : index
    %c0_30 = arith.constant 0 : index
    %51 = vector.load %arg16[%c2, %c0_30] : memref<11x64xf32, #tpu.memory_space<vmem>>, vector<8x64xf32>
    %52 = vector.extract_strided_slice %35 {offsets = [2, 0], sizes = [1, 64], strides = [1, 1]} : vector<4x64xf32> to vector<1x64xf32>
    %53 = vector.shape_cast %52 : vector<1x64xf32> to vector<64xf32>
    %54 = vector.shape_cast %53 : vector<64xf32> to vector<1x64xf32>
    %55 = vector.broadcast %54 : vector<1x64xf32> to vector<8x64xf32>
    %56 = arith.mulf %51, %55 : vector<8x64xf32>
    %57 = arith.addf %50, %56 : vector<8x64xf32>
    %c3_31 = arith.constant 3 : index
    %c0_32 = arith.constant 0 : index
    %58 = vector.load %arg16[%c3_31, %c0_32] : memref<11x64xf32, #tpu.memory_space<vmem>>, vector<8x64xf32>
    %59 = vector.extract_strided_slice %35 {offsets = [3, 0], sizes = [1, 64], strides = [1, 1]} : vector<4x64xf32> to vector<1x64xf32>
    %60 = vector.shape_cast %59 : vector<1x64xf32> to vector<64xf32>
    %61 = vector.shape_cast %60 : vector<64xf32> to vector<1x64xf32>
    %62 = vector.broadcast %61 : vector<1x64xf32> to vector<8x64xf32>
    %63 = arith.mulf %58, %62 : vector<8x64xf32>
    %64 = arith.addf %57, %63 : vector<8x64xf32>
    %65 = vector.broadcast %28 : vector<1x64xf32> to vector<8x64xf32>
    %66 = arith.addf %64, %65 : vector<8x64xf32>
    %cst_33 = arith.constant 0.000000e+00 : f32
    %67 = vector.broadcast %cst_33 : f32 to vector<8x64xf32>
    %68 = arith.subf %67, %66 : vector<8x64xf32>
    %69 = math.exp %68 : vector<8x64xf32>
    %cst_34 = arith.constant 1.000000e+00 : f32
    %70 = vector.broadcast %cst_34 : f32 to vector<8x64xf32>
    %71 = arith.addf %70, %69 : vector<8x64xf32>
    %cst_35 = arith.constant 1.000000e+00 : f32
    %72 = vector.broadcast %cst_35 : f32 to vector<8x64xf32>
    %73 = arith.divf %72, %71 : vector<8x64xf32>
    %74 = arith.mulf %66, %73 : vector<8x64xf32>
    %75 = arith.truncf %74 : vector<8x64xf32> to vector<8x64xbf16>
    %c0_36 = arith.constant 0 : index
    %c0_37 = arith.constant 0 : index
    %c0_38 = arith.constant 0 : index
    %76 = vector.load %arg11[%c0_36, %c0_37, %c0_38] : memref<1x64x384xbf16, #tpu.memory_space<vmem>>, vector<1x64x384xbf16>
    %77 = vector.shape_cast %76 : vector<1x64x384xbf16> to vector<64x384xbf16>
    %cst_39 = arith.constant dense<0.000000e+00> : vector<8x384xf32>
    %78 = tpu.matmul %75, %77, %cst_39 {dimension_numbers = #tpu.dot_dimension_numbers<[1], [0], [0], [1], [0, 0, 1, 1], [], []>} : vector<8x64xbf16>, vector<64x384xbf16>, vector<8x384xf32> -> vector<8x384xf32>
    %79 = vector.extract_strided_slice %78 {offsets = [0, 0], sizes = [8, 128], strides = [1, 1]} : vector<8x384xf32> to vector<8x128xf32>
    %80 = vector.extract_strided_slice %78 {offsets = [0, 128], sizes = [8, 8], strides = [1, 1]} : vector<8x384xf32> to vector<8x8xf32>
    %81 = vector.extract_strided_slice %78 {offsets = [0, 256], sizes = [8, 8], strides = [1, 1]} : vector<8x384xf32> to vector<8x8xf32>
    %c0_40 = arith.constant 0 : index
    %c0_41 = arith.constant 0 : index
    %82 = vector.load %arg19[%c0_40, %c0_41] : memref<8x8xf32, #tpu.memory_space<vmem>>, vector<8x8xf32>
    tpu.vector_store %arg19[%c0_40, %c0_41], %81 {strides = array<i32>} : memref<8x8xf32, #tpu.memory_space<vmem>>, vector<8x8xf32>,
    %83 = arith.truncf %79 : vector<8x128xf32> to vector<8x128xbf16>
    %c0_42 = arith.constant 0 : index
    %c0_43 = arith.constant 0 : index
    %c0_44 = arith.constant 0 : index
    %84 = vector.load %arg12[%c0_42, %c0_43, %c0_44] : memref<1x128x64xbf16, #tpu.memory_space<vmem>>, vector<1x128x64xbf16>
    %85 = vector.shape_cast %84 : vector<1x128x64xbf16> to vector<128x64xbf16>
    %cst_45 = arith.constant dense<0.000000e+00> : vector<8x64xf32>
    %86 = tpu.matmul %83, %85, %cst_45 {dimension_numbers = #tpu.dot_dimension_numbers<[1], [0], [0], [1], [0, 0, 1, 1], [], []>} : vector<8x128xbf16>, vector<128x64xbf16>, vector<8x64xf32> -> vector<8x64xf32>
    %87 = vector.broadcast %29 : vector<1x64xf32> to vector<8x64xf32>
    %88 = arith.addf %86, %87 : vector<8x64xf32>
    %cst_46 = arith.constant 0.000000e+00 : f32
    %89 = vector.broadcast %cst_46 : f32 to vector<8x64xf32>
    %90 = arith.maximumf %88, %89 : vector<8x64xf32>
    %91 = math.absf %88 : vector<8x64xf32>
    %cst_47 = arith.constant 0.000000e+00 : f32
    %92 = vector.broadcast %cst_47 : f32 to vector<8x64xf32>
    %93 = arith.subf %92, %91 : vector<8x64xf32>
    %94 = math.exp %93 : vector<8x64xf32>
    %cst_48 = arith.constant 1.000000e+00 : f32
    %95 = vector.broadcast %cst_48 : f32 to vector<8x64xf32>
    %96 = arith.addf %95, %94 : vector<8x64xf32>
    %97 = math.log %96 : vector<8x64xf32>
    %98 = arith.addf %90, %97 : vector<8x64xf32>
    %c0_49 = arith.constant 0 : index
    %c0_50 = arith.constant 0 : index
    %c0_51 = arith.constant 0 : index
    %99 = vector.load %arg13[%c0_49, %c0_50, %c0_51] : memref<1x8x64xf32, #tpu.memory_space<vmem>>, vector<1x8x64xf32>
    %100 = vector.shape_cast %99 : vector<1x8x64xf32> to vector<8x64xf32>
    %101 = math.exp %100 : vector<8x64xf32>
    %cst_52 = arith.constant 0.000000e+00 : f32
    %102 = vector.broadcast %cst_52 : f32 to vector<8x64xf32>
    %103 = arith.subf %102, %101 : vector<8x64xf32>
    %104 = arith.mulf %98, %74 : vector<8x64xf32>
    %cst_53 = arith.constant 0.000000e+00 : f32
    %105 = vector.broadcast %cst_53 : f32 to vector<8x64xf32>
    %106 = vector.shape_cast %98 : vector<8x64xf32> to vector<8x1x64xf32>
    %107 = vector.shape_cast %103 : vector<8x64xf32> to vector<1x8x64xf32>
    %108 = vector.broadcast %106 : vector<8x1x64xf32> to vector<8x8x64xf32>
    %109 = vector.broadcast %107 : vector<1x8x64xf32> to vector<8x8x64xf32>
    %110 = arith.mulf %108, %109 : vector<8x8x64xf32>
    %111 = math.exp %110 : vector<8x8x64xf32>
    %c0_54 = arith.constant 0 : index
    %c0_55 = arith.constant 0 : index
    %c0_56 = arith.constant 0 : index
    %112 = vector.load %arg17[%c0_54, %c0_55, %c0_56] : memref<8x8x64xf32, #tpu.memory_space<vmem>>, vector<8x8x64xf32>
    tpu.vector_store %arg17[%c0_54, %c0_55, %c0_56], %111 {strides = array<i32>} : memref<8x8x64xf32, #tpu.memory_space<vmem>>, vector<8x8x64xf32>,
    %113 = vector.shape_cast %80 : vector<8x8xf32> to vector<8x8x1xf32>
    %114 = vector.shape_cast %104 : vector<8x64xf32> to vector<8x1x64xf32>
    %115 = vector.broadcast %113 : vector<8x8x1xf32> to vector<8x8x64xf32>
    %116 = vector.broadcast %114 : vector<8x1x64xf32> to vector<8x8x64xf32>
    %117 = arith.mulf %115, %116 : vector<8x8x64xf32>
    %c0_57 = arith.constant 0 : index
    %c0_58 = arith.constant 0 : index
    %c0_59 = arith.constant 0 : index
    %118 = vector.load %arg18[%c0_57, %c0_58, %c0_59] : memref<8x8x64xf32, #tpu.memory_space<vmem>>, vector<8x8x64xf32>
    tpu.vector_store %arg18[%c0_57, %c0_58, %c0_59], %117 {strides = array<i32>} : memref<8x8x64xf32, #tpu.memory_space<vmem>>, vector<8x8x64xf32>,
    %c0_i32_60 = arith.constant 0 : i32
    %119 = arith.index_cast %c0_i32_60 : i32 to index
    %c0_61 = arith.constant 0 : index
    %c0_62 = arith.constant 0 : index
    %120 = vector.load %arg17[%119, %c0_61, %c0_62] : memref<8x8x64xf32, #tpu.memory_space<vmem>>, vector<1x8x64xf32>
    %121 = vector.shape_cast %120 : vector<1x8x64xf32> to vector<8x64xf32>
    %122 = arith.mulf %121, %105 : vector<8x64xf32>
    %123 = arith.index_cast %c0_i32_60 : i32 to index
    %c0_63 = arith.constant 0 : index
    %c0_64 = arith.constant 0 : index
    %124 = vector.load %arg18[%123, %c0_63, %c0_64] : memref<8x8x64xf32, #tpu.memory_space<vmem>>, vector<1x8x64xf32>
    %125 = vector.shape_cast %124 : vector<1x8x64xf32> to vector<8x64xf32>
    %126 = arith.addf %122, %125 : vector<8x64xf32>
    %c0_i32_65 = arith.constant 0 : i32
    %127 = arith.addi %c0_i32_65, %c0_i32_60 : i32
    %128 = arith.index_cast %127 : i32 to index
    %c0_66 = arith.constant 0 : index
    %129 = vector.load %arg19[%128, %c0_66] : memref<8x8xf32, #tpu.memory_space<vmem>>, vector<1x8xf32>
    %cst_67 = arith.constant dense<0.000000e+00> : vector<1x64xf32>
    %130 = tpu.matmul %129, %126, %cst_67 {dimension_numbers = #tpu.dot_dimension_numbers<[1], [0], [0], [1], [0, 0, 1, 1], [], []>} : vector<1x8xf32>, vector<8x64xf32>, vector<1x64xf32> -> vector<1x64xf32>
    %c0_i32_68 = arith.constant 0 : i32
    %131 = arith.addi %c0_i32_68, %c0_i32_60 : i32
    %132 = arith.index_cast %131 : i32 to index
    %c0_69 = arith.constant 0 : index
    %133 = vector.load %arg20[%132, %c0_69] : memref<8x64xf32, #tpu.memory_space<vmem>>, vector<1x64xf32>
    tpu.vector_store %arg20[%132, %c0_69], %130 {strides = array<i32>} : memref<8x64xf32, #tpu.memory_space<vmem>>, vector<1x64xf32>,
    %c1_i32 = arith.constant 1 : i32
    %134 = arith.index_cast %c1_i32 : i32 to index
    %c0_70 = arith.constant 0 : index
    %c0_71 = arith.constant 0 : index
    %135 = vector.load %arg17[%134, %c0_70, %c0_71] : memref<8x8x64xf32, #tpu.memory_space<vmem>>, vector<1x8x64xf32>
    %136 = vector.shape_cast %135 : vector<1x8x64xf32> to vector<8x64xf32>
    %137 = arith.mulf %136, %126 : vector<8x64xf32>
    %138 = arith.index_cast %c1_i32 : i32 to index
    %c0_72 = arith.constant 0 : index
    %c0_73 = arith.constant 0 : index
    %139 = vector.load %arg18[%138, %c0_72, %c0_73] : memref<8x8x64xf32, #tpu.memory_space<vmem>>, vector<1x8x64xf32>
    %140 = vector.shape_cast %139 : vector<1x8x64xf32> to vector<8x64xf32>
    %141 = arith.addf %137, %140 : vector<8x64xf32>
    %c0_i32_74 = arith.constant 0 : i32
    %142 = arith.addi %c0_i32_74, %c1_i32 : i32
    %143 = arith.index_cast %142 : i32 to index
    %c0_75 = arith.constant 0 : index
    %144 = vector.load %arg19[%143, %c0_75] : memref<8x8xf32, #tpu.memory_space<vmem>>, vector<1x8xf32>
    %cst_76 = arith.constant dense<0.000000e+00> : vector<1x64xf32>
    %145 = tpu.matmul %144, %141, %cst_76 {dimension_numbers = #tpu.dot_dimension_numbers<[1], [0], [0], [1], [0, 0, 1, 1], [], []>} : vector<1x8xf32>, vector<8x64xf32>, vector<1x64xf32> -> vector<1x64xf32>
    %c0_i32_77 = arith.constant 0 : i32
    %146 = arith.addi %c0_i32_77, %c1_i32 : i32
    %147 = arith.index_cast %146 : i32 to index
    %c0_78 = arith.constant 0 : index
    %148 = vector.load %arg20[%147, %c0_78] : memref<8x64xf32, #tpu.memory_space<vmem>>, vector<1x64xf32>
    tpu.vector_store %arg20[%147, %c0_78], %145 {strides = array<i32>} : memref<8x64xf32, #tpu.memory_space<vmem>>, vector<1x64xf32>,
    %c2_i32 = arith.constant 2 : i32
    %149 = arith.index_cast %c2_i32 : i32 to index
    %c0_79 = arith.constant 0 : index
    %c0_80 = arith.constant 0 : index
    %150 = vector.load %arg17[%149, %c0_79, %c0_80] : memref<8x8x64xf32, #tpu.memory_space<vmem>>, vector<1x8x64xf32>
    %151 = vector.shape_cast %150 : vector<1x8x64xf32> to vector<8x64xf32>
    %152 = arith.mulf %151, %141 : vector<8x64xf32>
    %153 = arith.index_cast %c2_i32 : i32 to index
    %c0_81 = arith.constant 0 : index
    %c0_82 = arith.constant 0 : index
    %154 = vector.load %arg18[%153, %c0_81, %c0_82] : memref<8x8x64xf32, #tpu.memory_space<vmem>>, vector<1x8x64xf32>
    %155 = vector.shape_cast %154 : vector<1x8x64xf32> to vector<8x64xf32>
    %156 = arith.addf %152, %155 : vector<8x64xf32>
    %c0_i32_83 = arith.constant 0 : i32
    %157 = arith.addi %c0_i32_83, %c2_i32 : i32
    %158 = arith.index_cast %157 : i32 to index
    %c0_84 = arith.constant 0 : index
    %159 = vector.load %arg19[%158, %c0_84] : memref<8x8xf32, #tpu.memory_space<vmem>>, vector<1x8xf32>
    %cst_85 = arith.constant dense<0.000000e+00> : vector<1x64xf32>
    %160 = tpu.matmul %159, %156, %cst_85 {dimension_numbers = #tpu.dot_dimension_numbers<[1], [0], [0], [1], [0, 0, 1, 1], [], []>} : vector<1x8xf32>, vector<8x64xf32>, vector<1x64xf32> -> vector<1x64xf32>
    %c0_i32_86 = arith.constant 0 : i32
    %161 = arith.addi %c0_i32_86, %c2_i32 : i32
    %162 = arith.index_cast %161 : i32 to index
    %c0_87 = arith.constant 0 : index
    %163 = vector.load %arg20[%162, %c0_87] : memref<8x64xf32, #tpu.memory_space<vmem>>, vector<1x64xf32>
    tpu.vector_store %arg20[%162, %c0_87], %160 {strides = array<i32>} : memref<8x64xf32, #tpu.memory_space<vmem>>, vector<1x64xf32>,
    %c3_i32 = arith.constant 3 : i32
    %164 = arith.index_cast %c3_i32 : i32 to index
    %c0_88 = arith.constant 0 : index
    %c0_89 = arith.constant 0 : index
    %165 = vector.load %arg17[%164, %c0_88, %c0_89] : memref<8x8x64xf32, #tpu.memory_space<vmem>>, vector<1x8x64xf32>
    %166 = vector.shape_cast %165 : vector<1x8x64xf32> to vector<8x64xf32>
    %167 = arith.mulf %166, %156 : vector<8x64xf32>
    %168 = arith.index_cast %c3_i32 : i32 to index
    %c0_90 = arith.constant 0 : index
    %c0_91 = arith.constant 0 : index
    %169 = vector.load %arg18[%168, %c0_90, %c0_91] : memref<8x8x64xf32, #tpu.memory_space<vmem>>, vector<1x8x64xf32>
    %170 = vector.shape_cast %169 : vector<1x8x64xf32> to vector<8x64xf32>
    %171 = arith.addf %167, %170 : vector<8x64xf32>
    %c0_i32_92 = arith.constant 0 : i32
    %172 = arith.addi %c0_i32_92, %c3_i32 : i32
    %173 = arith.index_cast %172 : i32 to index
    %c0_93 = arith.constant 0 : index
    %174 = vector.load %arg19[%173, %c0_93] : memref<8x8xf32, #tpu.memory_space<vmem>>, vector<1x8xf32>
    %cst_94 = arith.constant dense<0.000000e+00> : vector<1x64xf32>
    %175 = tpu.matmul %174, %171, %cst_94 {dimension_numbers = #tpu.dot_dimension_numbers<[1], [0], [0], [1], [0, 0, 1, 1], [], []>} : vector<1x8xf32>, vector<8x64xf32>, vector<1x64xf32> -> vector<1x64xf32>
    %c0_i32_95 = arith.constant 0 : i32
    %176 = arith.addi %c0_i32_95, %c3_i32 : i32
    %177 = arith.index_cast %176 : i32 to index
    %c0_96 = arith.constant 0 : index
    %178 = vector.load %arg20[%177, %c0_96] : memref<8x64xf32, #tpu.memory_space<vmem>>, vector<1x64xf32>
    tpu.vector_store %arg20[%177, %c0_96], %175 {strides = array<i32>} : memref<8x64xf32, #tpu.memory_space<vmem>>, vector<1x64xf32>,
    %c4_i32 = arith.constant 4 : i32
    %179 = arith.index_cast %c4_i32 : i32 to index
    %c0_97 = arith.constant 0 : index
    %c0_98 = arith.constant 0 : index
    %180 = vector.load %arg17[%179, %c0_97, %c0_98] : memref<8x8x64xf32, #tpu.memory_space<vmem>>, vector<1x8x64xf32>
    %181 = vector.shape_cast %180 : vector<1x8x64xf32> to vector<8x64xf32>
    %182 = arith.mulf %181, %171 : vector<8x64xf32>
    %183 = arith.index_cast %c4_i32 : i32 to index
    %c0_99 = arith.constant 0 : index
    %c0_100 = arith.constant 0 : index
    %184 = vector.load %arg18[%183, %c0_99, %c0_100] : memref<8x8x64xf32, #tpu.memory_space<vmem>>, vector<1x8x64xf32>
    %185 = vector.shape_cast %184 : vector<1x8x64xf32> to vector<8x64xf32>
    %186 = arith.addf %182, %185 : vector<8x64xf32>
    %c0_i32_101 = arith.constant 0 : i32
    %187 = arith.addi %c0_i32_101, %c4_i32 : i32
    %188 = arith.index_cast %187 : i32 to index
    %c0_102 = arith.constant 0 : index
    %189 = vector.load %arg19[%188, %c0_102] : memref<8x8xf32, #tpu.memory_space<vmem>>, vector<1x8xf32>
    %cst_103 = arith.constant dense<0.000000e+00> : vector<1x64xf32>
    %190 = tpu.matmul %189, %186, %cst_103 {dimension_numbers = #tpu.dot_dimension_numbers<[1], [0], [0], [1], [0, 0, 1, 1], [], []>} : vector<1x8xf32>, vector<8x64xf32>, vector<1x64xf32> -> vector<1x64xf32>
    %c0_i32_104 = arith.constant 0 : i32
    %191 = arith.addi %c0_i32_104, %c4_i32 : i32
    %192 = arith.index_cast %191 : i32 to index
    %c0_105 = arith.constant 0 : index
    %193 = vector.load %arg20[%192, %c0_105] : memref<8x64xf32, #tpu.memory_space<vmem>>, vector<1x64xf32>
    tpu.vector_store %arg20[%192, %c0_105], %190 {strides = array<i32>} : memref<8x64xf32, #tpu.memory_space<vmem>>, vector<1x64xf32>,
    %c5_i32 = arith.constant 5 : i32
    %194 = arith.index_cast %c5_i32 : i32 to index
    %c0_106 = arith.constant 0 : index
    %c0_107 = arith.constant 0 : index
    %195 = vector.load %arg17[%194, %c0_106, %c0_107] : memref<8x8x64xf32, #tpu.memory_space<vmem>>, vector<1x8x64xf32>
    %196 = vector.shape_cast %195 : vector<1x8x64xf32> to vector<8x64xf32>
    %197 = arith.mulf %196, %186 : vector<8x64xf32>
    %198 = arith.index_cast %c5_i32 : i32 to index
    %c0_108 = arith.constant 0 : index
    %c0_109 = arith.constant 0 : index
    %199 = vector.load %arg18[%198, %c0_108, %c0_109] : memref<8x8x64xf32, #tpu.memory_space<vmem>>, vector<1x8x64xf32>
    %200 = vector.shape_cast %199 : vector<1x8x64xf32> to vector<8x64xf32>
    %201 = arith.addf %197, %200 : vector<8x64xf32>
    %c0_i32_110 = arith.constant 0 : i32
    %202 = arith.addi %c0_i32_110, %c5_i32 : i32
    %203 = arith.index_cast %202 : i32 to index
    %c0_111 = arith.constant 0 : index
    %204 = vector.load %arg19[%203, %c0_111] : memref<8x8xf32, #tpu.memory_space<vmem>>, vector<1x8xf32>
    %cst_112 = arith.constant dense<0.000000e+00> : vector<1x64xf32>
    %205 = tpu.matmul %204, %201, %cst_112 {dimension_numbers = #tpu.dot_dimension_numbers<[1], [0], [0], [1], [0, 0, 1, 1], [], []>} : vector<1x8xf32>, vector<8x64xf32>, vector<1x64xf32> -> vector<1x64xf32>
    %c0_i32_113 = arith.constant 0 : i32
    %206 = arith.addi %c0_i32_113, %c5_i32 : i32
    %207 = arith.index_cast %206 : i32 to index
    %c0_114 = arith.constant 0 : index
    %208 = vector.load %arg20[%207, %c0_114] : memref<8x64xf32, #tpu.memory_space<vmem>>, vector<1x64xf32>
    tpu.vector_store %arg20[%207, %c0_114], %205 {strides = array<i32>} : memref<8x64xf32, #tpu.memory_space<vmem>>, vector<1x64xf32>,
    %c6_i32 = arith.constant 6 : i32
    %209 = arith.index_cast %c6_i32 : i32 to index
    %c0_115 = arith.constant 0 : index
    %c0_116 = arith.constant 0 : index
    %210 = vector.load %arg17[%209, %c0_115, %c0_116] : memref<8x8x64xf32, #tpu.memory_space<vmem>>, vector<1x8x64xf32>
    %211 = vector.shape_cast %210 : vector<1x8x64xf32> to vector<8x64xf32>
    %212 = arith.mulf %211, %201 : vector<8x64xf32>
    %213 = arith.index_cast %c6_i32 : i32 to index
    %c0_117 = arith.constant 0 : index
    %c0_118 = arith.constant 0 : index
    %214 = vector.load %arg18[%213, %c0_117, %c0_118] : memref<8x8x64xf32, #tpu.memory_space<vmem>>, vector<1x8x64xf32>
    %215 = vector.shape_cast %214 : vector<1x8x64xf32> to vector<8x64xf32>
    %216 = arith.addf %212, %215 : vector<8x64xf32>
    %c0_i32_119 = arith.constant 0 : i32
    %217 = arith.addi %c0_i32_119, %c6_i32 : i32
    %218 = arith.index_cast %217 : i32 to index
    %c0_120 = arith.constant 0 : index
    %219 = vector.load %arg19[%218, %c0_120] : memref<8x8xf32, #tpu.memory_space<vmem>>, vector<1x8xf32>
    %cst_121 = arith.constant dense<0.000000e+00> : vector<1x64xf32>
    %220 = tpu.matmul %219, %216, %cst_121 {dimension_numbers = #tpu.dot_dimension_numbers<[1], [0], [0], [1], [0, 0, 1, 1], [], []>} : vector<1x8xf32>, vector<8x64xf32>, vector<1x64xf32> -> vector<1x64xf32>
    %c0_i32_122 = arith.constant 0 : i32
    %221 = arith.addi %c0_i32_122, %c6_i32 : i32
    %222 = arith.index_cast %221 : i32 to index
    %c0_123 = arith.constant 0 : index
    %223 = vector.load %arg20[%222, %c0_123] : memref<8x64xf32, #tpu.memory_space<vmem>>, vector<1x64xf32>
    tpu.vector_store %arg20[%222, %c0_123], %220 {strides = array<i32>} : memref<8x64xf32, #tpu.memory_space<vmem>>, vector<1x64xf32>,
    %c7_i32 = arith.constant 7 : i32
    %224 = arith.index_cast %c7_i32 : i32 to index
    %c0_124 = arith.constant 0 : index
    %c0_125 = arith.constant 0 : index
    %225 = vector.load %arg17[%224, %c0_124, %c0_125] : memref<8x8x64xf32, #tpu.memory_space<vmem>>, vector<1x8x64xf32>
    %226 = vector.shape_cast %225 : vector<1x8x64xf32> to vector<8x64xf32>
    %227 = arith.mulf %226, %216 : vector<8x64xf32>
    %228 = arith.index_cast %c7_i32 : i32 to index
    %c0_126 = arith.constant 0 : index
    %c0_127 = arith.constant 0 : index
    %229 = vector.load %arg18[%228, %c0_126, %c0_127] : memref<8x8x64xf32, #tpu.memory_space<vmem>>, vector<1x8x64xf32>
    %230 = vector.shape_cast %229 : vector<1x8x64xf32> to vector<8x64xf32>
    %231 = arith.addf %227, %230 : vector<8x64xf32>
    %c0_i32_128 = arith.constant 0 : i32
    %232 = arith.addi %c0_i32_128, %c7_i32 : i32
    %233 = arith.index_cast %232 : i32 to index
    %c0_129 = arith.constant 0 : index
    %234 = vector.load %arg19[%233, %c0_129] : memref<8x8xf32, #tpu.memory_space<vmem>>, vector<1x8xf32>
    %cst_130 = arith.constant dense<0.000000e+00> : vector<1x64xf32>
    %235 = tpu.matmul %234, %231, %cst_130 {dimension_numbers = #tpu.dot_dimension_numbers<[1], [0], [0], [1], [0, 0, 1, 1], [], []>} : vector<1x8xf32>, vector<8x64xf32>, vector<1x64xf32> -> vector<1x64xf32>
    %c0_i32_131 = arith.constant 0 : i32
    %236 = arith.addi %c0_i32_131, %c7_i32 : i32
    %237 = arith.index_cast %236 : i32 to index
    %c0_132 = arith.constant 0 : index
    %238 = vector.load %arg20[%237, %c0_132] : memref<8x64xf32, #tpu.memory_space<vmem>>, vector<1x64xf32>
    tpu.vector_store %arg20[%237, %c0_132], %235 {strides = array<i32>} : memref<8x64xf32, #tpu.memory_space<vmem>>, vector<1x64xf32>,
    %c8_i32 = arith.constant 8 : i32
    %c0_133 = arith.constant 0 : index
    %c0_134 = arith.constant 0 : index
    %239 = vector.load %arg20[%c0_133, %c0_134] : memref<8x64xf32, #tpu.memory_space<vmem>>, vector<8x64xf32>
    %240 = vector.broadcast %30 : vector<1x64xf32> to vector<8x64xf32>
    %241 = arith.mulf %74, %240 : vector<8x64xf32>
    %242 = arith.addf %239, %241 : vector<8x64xf32>
    %cst_135 = arith.constant 0.000000e+00 : f32
    %243 = vector.broadcast %cst_135 : f32 to vector<8x64xf32>
    %244 = arith.subf %243, %25 : vector<8x64xf32>
    %245 = math.exp %244 : vector<8x64xf32>
    %cst_136 = arith.constant 1.000000e+00 : f32
    %246 = vector.broadcast %cst_136 : f32 to vector<8x64xf32>
    %247 = arith.addf %246, %245 : vector<8x64xf32>
    %cst_137 = arith.constant 1.000000e+00 : f32
    %248 = vector.broadcast %cst_137 : f32 to vector<8x64xf32>
    %249 = arith.divf %248, %247 : vector<8x64xf32>
    %250 = arith.mulf %25, %249 : vector<8x64xf32>
    %251 = arith.mulf %242, %250 : vector<8x64xf32>
    %252 = arith.truncf %251 : vector<8x64xf32> to vector<8x64xbf16>
    %c0_138 = arith.constant 0 : index
    %c0_139 = arith.constant 0 : index
    %c0_140 = arith.constant 0 : index
    %253 = vector.load %arg14[%c0_138, %c0_139, %c0_140] : memref<1x64x32xbf16, #tpu.memory_space<vmem>>, vector<1x64x32xbf16>
    %254 = vector.shape_cast %253 : vector<1x64x32xbf16> to vector<64x32xbf16>
    %cst_141 = arith.constant dense<0.000000e+00> : vector<8x32xf32>
    %255 = tpu.matmul %252, %254, %cst_141 {dimension_numbers = #tpu.dot_dimension_numbers<[1], [0], [0], [1], [0, 0, 1, 1], [], []>} : vector<8x64xbf16>, vector<64x32xbf16>, vector<8x32xf32> -> vector<8x32xf32>
    %256 = arith.addf %4, %255 : vector<8x32xf32>
    %c0_142 = arith.constant 0 : index
    %c0_143 = arith.constant 0 : index
    %c0_144 = arith.constant 0 : index
    %257 = vector.load %arg15[%c0_142, %c0_143, %c0_144] : memref<1x8x32xf32, #tpu.memory_space<vmem>>, vector<1x8x32xf32>
    %258 = vector.shape_cast %257 : vector<1x8x32xf32> to vector<8x32xf32>
    %259 = vector.shape_cast %256 : vector<8x32xf32> to vector<1x8x32xf32>
    tpu.vector_store %arg15[%c0_142, %c0_143, %c0_144], %259 {strides = array<i32>} : memref<1x8x32xf32, #tpu.memory_space<vmem>>, vector<1x8x32xf32>,
    return
  }
  func.func @transform_0(%arg0: i32, %arg1: i32) -> (i32, i32, i32) {
    %c0_i32 = arith.constant 0 : i32
    %c0_i32_0 = arith.constant 0 : i32
    %c0_i32_1 = arith.constant 0 : i32
    return %arg0, %c0_i32, %c0_i32_0 : i32, i32, i32
  }
  func.func @transform_1(%arg0: i32, %arg1: i32) -> (i32, i32, i32) {
    %c0_i32 = arith.constant 0 : i32
    %c0_i32_0 = arith.constant 0 : i32
    %c0_i32_1 = arith.constant 0 : i32
    return %arg0, %c0_i32, %c0_i32_0 : i32, i32, i32
  }
  func.func @transform_2(%arg0: i32, %arg1: i32) -> (i32, i32) {
    %c0_i32 = arith.constant 0 : i32
    %c0_i32_0 = arith.constant 0 : i32
    %c0_i32_1 = arith.constant 0 : i32
    return %c0_i32, %c0_i32_0 : i32, i32
  }
  func.func @transform_3(%arg0: i32, %arg1: i32) -> (i32, i32) {
    %c0_i32 = arith.constant 0 : i32
    %c0_i32_0 = arith.constant 0 : i32
    %c0_i32_1 = arith.constant 0 : i32
    return %c0_i32, %c0_i32_0 : i32, i32
  }
  func.func @transform_4(%arg0: i32, %arg1: i32) -> (i32, i32, i32) {
    %c0_i32 = arith.constant 0 : i32
    %c0_i32_0 = arith.constant 0 : i32
    %c0_i32_1 = arith.constant 0 : i32
    return %arg1, %c0_i32, %c0_i32_0 : i32, i32, i32
  }
  func.func @transform_5(%arg0: i32, %arg1: i32) -> (i32, i32, i32) {
    %c0_i32 = arith.constant 0 : i32
    %c0_i32_0 = arith.constant 0 : i32
    %c0_i32_1 = arith.constant 0 : i32
    return %arg1, %c0_i32, %c0_i32_0 : i32, i32, i32
  }
  func.func @transform_6(%arg0: i32, %arg1: i32) -> (i32, i32, i32) {
    %c0_i32 = arith.constant 0 : i32
    %c0_i32_0 = arith.constant 0 : i32
    %c0_i32_1 = arith.constant 0 : i32
    return %arg1, %c0_i32, %c0_i32_0 : i32, i32, i32
  }
  func.func @transform_7(%arg0: i32, %arg1: i32) -> (i32, i32, i32) {
    %c0_i32 = arith.constant 0 : i32
    %c0_i32_0 = arith.constant 0 : i32
    %c0_i32_1 = arith.constant 0 : i32
    return %arg1, %c0_i32, %c0_i32_0 : i32, i32, i32
  }
  func.func @transform_8(%arg0: i32, %arg1: i32) -> (i32, i32, i32) {
    %c0_i32 = arith.constant 0 : i32
    %c0_i32_0 = arith.constant 0 : i32
    %c0_i32_1 = arith.constant 0 : i32
    return %arg1, %c0_i32, %c0_i32_0 : i32, i32, i32
  }
  func.func @transform_9(%arg0: i32, %arg1: i32) -> (i32, i32, i32) {
    %c0_i32 = arith.constant 0 : i32
    %c0_i32_0 = arith.constant 0 : i32
    %c0_i32_1 = arith.constant 0 : i32
    return %arg1, %c0_i32, %c0_i32_0 : i32, i32, i32
  }
  func.func @transform_10(%arg0: i32, %arg1: i32) -> (i32, i32, i32) {
    %c0_i32 = arith.constant 0 : i32
    %c0_i32_0 = arith.constant 0 : i32
    %c0_i32_1 = arith.constant 0 : i32
    return %arg1, %c0_i32, %c0_i32_0 : i32, i32, i32
  }
  func.func @transform_11(%arg0: i32, %arg1: i32) -> (i32, i32, i32) {
    %c0_i32 = arith.constant 0 : i32
    %c0_i32_0 = arith.constant 0 : i32
    %c0_i32_1 = arith.constant 0 : i32
    return %arg1, %c0_i32, %c0_i32_0 : i32, i32, i32
  }
  func.func @transform_12(%arg0: i32, %arg1: i32) -> (i32, i32, i32) {
    %c0_i32 = arith.constant 0 : i32
    %c0_i32_0 = arith.constant 0 : i32
    %c0_i32_1 = arith.constant 0 : i32
    return %arg1, %c0_i32, %c0_i32_0 : i32, i32, i32
  }
  func.func @transform_13(%arg0: i32, %arg1: i32) -> (i32, i32, i32) {
    %c0_i32 = arith.constant 0 : i32
    %c0_i32_0 = arith.constant 0 : i32
    %c0_i32_1 = arith.constant 0 : i32
    return %arg0, %c0_i32, %c0_i32_0 : i32, i32, i32
  }
}

</mosaic_0001>

<bundles_post_ra>
// kernel: tpu_custom_call.1
= control target key start
LH: loop header
LB: loop body
LE: loop exit
PB: predicated region body
PF: predicated region fallthrough
CT: control target
= control target key end

     0   :  { %s3841_s0 = inlined_call_operand.hbm [shape: f32[2,8,32], index: 0, kind: input, shape index: {}]   ;;  %s3842_s1 = inlined_call_operand.vmem [shape: f32[2,8,1], index: 1, kind: input, shape index: {}]   ;;  %s3843_s2 = inlined_call_operand.vmem [shape: f32[1,32], index: 2, kind: input, shape index: {}]   ;;  %s3844_s3 = inlined_call_operand.hbm [shape: f32[1,32], index: 3, kind: input, shape index: {}]   ;;  %s3845_s4 = inlined_call_operand.hbm [shape: f32[2,1,32], index: 4, kind: input, shape index: {}]   ;;  %s3846_s5 = inlined_call_operand.vmem [shape: bf16[2,32,64], index: 5, kind: input, shape index: {}]   ;;  %s3847_s6 = inlined_call_operand.vmem [shape: bf16[2,32,64], index: 6, kind: input, shape index: {}]   ;;  %s3848_s7 = inlined_call_operand.vmem [shape: f32[2,4,64], index: 7, kind: input, shape index: {}]   ;;  %s3849_s8 = inlined_call_operand.vmem [shape: f32[2,3,64], index: 8, kind: input, shape index: {}]   ;;  %s3850_s9 = inlined_call_operand.vmem [shape: bf16[2,64,384], index: 9, kind: input, shape index: {}]   ;;  %s3851_s10 = inlined_call_operand.vmem [shape: bf16[2,128,64], index: 10, kind: input, shape index: {}]   ;;  %s3852_s11 = inlined_call_operand.hbm [shape: f32[2,8,64], index: 11, kind: input, shape index: {}]   ;;  %s3853_s12 = inlined_call_operand.vmem [shape: bf16[2,64,32], index: 12, kind: input, shape index: {}]   ;;  %s3854_s13 = inlined_call_operand.hbm [shape: f32[2,8,32], index: 13, kind: output, shape index: {}]  }
   0x1   :  { %3879 = sst [smem:[#allocation32_spill]] %s3841_s0 }
   0x2   :  { %3880 = sst [smem:[#allocation33_spill]] %s3842_s1 }
   0x3   :  { %3881 = sst [smem:[#allocation34_spill]] %s3843_s2 }
   0x4   :  { %3882 = sst [smem:[#allocation35_spill]] %s3844_s3 }
   0x5   :  { %3883 = sst [smem:[#allocation36_spill]] %s3845_s4 }
   0x6   :  { %3884 = sst [smem:[#allocation37_spill]] %s3846_s5 }
   0x7   :  { %3885 = sst [smem:[#allocation38_spill]] %s3847_s6 }
   0x8   :  { %3886 = sst [smem:[#allocation39_spill]] %s3848_s7 }
   0x9   :  { %3887 = sst [smem:[#allocation40_spill]] %s3849_s8 }
   0xa   :  { %3888 = sst [smem:[#allocation41_spill]] %s3850_s9 }
   0xb   :  { %3889 = sst [smem:[#allocation42_spill]] %s3851_s10 }
   0xc   :  { %3890 = sst [smem:[#allocation43_spill]] %s3852_s11 }
   0xd   :  { %3891 = sst [smem:[#allocation44_spill]] %s3853_s12 }
   0xe   :  { %3892 = sst [smem:[#allocation45_spill]] %s3854_s13 }
   0xf   :  { %18 = vsyncpa [#allocation8], 0 }
  0x10   :  { %20 = vsyncpa [#allocation8 + $0x1], 0 }
  0x11   :  { %21 = vsyncpa [#allocation11], 0 }
  0x12   :  { %22 = vsyncpa [#allocation9], 0 }
  0x13   :  { %24 = vsyncpa [#allocation9 + $0x1], 0  ;;  %s3206_s25 = smov 0   ;;  %s3208_s26 = smov 0  }
  0x14   :  { %s3210_s27 = smov 0   ;;  %s3212_s28 = smov 0  }
  0x15   :  { %s3214_s29 = smov 0   ;;  %s3216_s30 = smov 0  }
  0x16   :  { %s3218_s14 = smov 0   ;;  %s3220_s15 = smov 0  }
  0x17   :  { %s3222_s16 = smov 0   ;;  %s3224_s17 = smov 0  }
  0x18   :  { %s3226_s18 = smov 0  }
  0x19 LB: > { %3893 = sst [smem:[#allocation19_spill]] %s3088_s26  ;;  %p3856_p0 = scmp.ne.s32.totalorder %s3104_s30, %s3100_s29  ;;  %s3124_s18 = sphi %s3226_s18, %s30_s18   ;;  %s3120_s17 = sphi %s3224_s17, %s3959_s17   ;;  %s3116_s16 = sphi %s3222_s16, %s3958_s16   ;;  %s3112_s15 = sphi %s3220_s15, %s3957_s15   ;;  %s3108_s14 = sphi %s3218_s14, %s3956_s14   ;;  %s3104_s30 = sphi %s3216_s30, %s3955_s30   ;;  %s3100_s29 = sphi %s3214_s29, %s3961_s29   ;;  %s3096_s28 = sphi %s3212_s28, %s3960_s28   ;;  %s3092_s27 = sphi %s3210_s27, %s3953_s27   ;;  %s3088_s26 = sphi %s3208_s26, %s3952_s26   ;;  %s3084_s25 = sphi %s3206_s25, %s3951_s25  }
  0x1a   : > { %3894 = sst [smem:[#allocation20_spill]] %s3092_s27  ;;  %p57_p1 = scmp.eq.s32.totalorder %s3124_s18, 0 }
  0x1b   : > { %3895 = sst [smem:[#allocation21_spill]] %s3096_s28  ;;  %p3857_p2 = scmp.lt.s32.totalorder %s3124_s18, 4 }
  0x1c   : > { %3896 = sst [smem:[#allocation22_spill]] %s3104_s30  ;;  %p58_p3 = por %p57_p1, %p3856_p0 }
  0x1d   : > { %3897 = sst [smem:[#allocation23_spill]] %s3116_s16  ;;  %s428_s21 = sand.u32 1, %s3124_s18  }
  0x1e   : > { %3898 = sst [smem:[#allocation24_spill]] %s3120_s17  ;;  %s430_s22 = sand.u32 1, %s3104_s30  }
  0x1f   : > { %3899 = sst [smem:[#allocation25_spill]] %s3124_s18  ;;  %s2466_s23 = sshll.u32 %s430_s22, 3 }
  0x20   : > { %s2467_s24 = sshll.u32 %s3120_s17, 7  ;;  %s3900_s0 = sld [smem:[#allocation32_spill]] }
  0x21   : > { %s432_s20 = scalar_lea.vmem [#allocation7], %s2466_s23  ;;  %p3282_p4 = pnand %p3857_p2, %p58_p3 }
  0x22   : > { %s439_s19 = sshll.u32 %s432_s20, 4  ;;  %s3288_s22 = scalar_lea.sflag [#allocation8], %s428_s21  ;;  %s3286_s19 = int_to_ptr.vmem [resolvable:$true] %s439_s19 }
  0x23   : > { %p2878_p6 = pneg %p3282_p4 }
  0x26   : > { %s3278_s12 = scalar_lea.hbm %s3900_s0, %s2467_s24  ;;  %s2881_s23 = scalar_lea.hbm %s3900_s0, 256 }
  0x27   : > { %s2876_s2 = scalar_lea.hbm %s3278_s12, 128  ;;  %p2882_p9 = scmp.lt.u32.totalorder %s3278_s12, %s3900_s0 }
  0x28   : > { %p2877_p5 = scmp.ne.s32.totalorder %s3278_s12, %s2876_s2  ;;  %p2883_p10 = scmp.lt.u32.totalorder %s2881_s23, %s2876_s2 }
  0x29   : > { %p2885_p12 = scmp.lt.u32.totalorder %s2876_s2, %s3278_s12 }
  0x2a   : > { %p2879_p7 = pnand %p2878_p6, %p2877_p5  ;;  %p2884_p11 = por %p2883_p10, %p2882_p9 }
  0x2c   : > { %p2880_p8 = pneg %p2879_p7  ;;  %p2886_p13 = por %p2885_p12, %p2884_p11 }
  0x2e   : > { %p2887_p3 = pnand %p2886_p13, %p2880_p8 }
  0x30   : > { %2890 = shalt.err (!%p2887_p3)
}
  0x31   : > { %s2891_s21 = scalar_lea.vmem %s3286_s19, 128  ;;  %s3126_s13 = smov [#allocation7]  }
  0x32   : > { %p2892_p5 = scmp.ne.s32.totalorder %s3286_s19, %s2891_s21  ;;  %s2896_s20 = sshll.u32 %s3126_s13, 4  ;;  %s2897_s20 = int_to_ptr.vmem [resolvable:$false] %s2896_s20 }
  0x33   : > { %s2898_s9 = scalar_lea.vmem %s2897_s20, 256  ;;  %p2899_p2 = scmp.lt.s32.totalorder %s3286_s19, %s2897_s20 }
  0x34   : > { %p2894_p7 = pnand %p2892_p5, %p2878_p6  ;;  %p2900_p9 = scmp.lt.s32.totalorder %s2898_s9, %s2891_s21 }
  0x36   : > { %p2895_p0 = pneg %p2894_p7  ;;  %p2901_p10 = por %p2900_p9, %p2899_p2 }
  0x38   : > { %p2902_p11 = pnand %p2901_p10, %p2895_p0 }
  0x3a   : > { %2905 = shalt.err (!%p2902_p11)
}
  0x3b   : > { %2702 = dma.hbm_to_vmem [thread:$0]  (!%p3282_p4), %s3278_s12, 128, %s3286_s19, %s3288_s22  }
  0x3c   : > { %s39_s2 = sadd.s32 1, %s3116_s16  ;;  %s143_s23 = sadd.s32 1, %s3092_s27 }
  0x3d   : > { %p40_p0 = scmp.ge.s32.totalorder %s39_s2, 2  ;;  %p150_p2 = scmp.ne.s32.totalorder %s3092_s27, %s3088_s26 }
  0x3e   : > { %s2468_s24 = sshll.u32 %s3116_s16, 4  ;;  %s3903_s21 = sadd.s32 1, %s3120_s17 }
  0x3f   : > { %s3963_s2 = smov (%p40_p0, %s39_s2), 0  ;;  %s3965_s21 = smov (!%p40_p0, %s3903_s21), %s3120_s17 }
  0x40   : > { %3902 = sst [smem:[#allocation26_spill]] %s3963_s2  ;;  %s140_s13 = ssub.s32 %s3116_s16, %s3963_s2 }
  0x41   : > { %p152_p6 = por %p150_p2, %p57_p1  ;;  %p44_p4 = scmp.ge.s32.totalorder %s3965_s21, 2 }
  0x42   : > { %p141_p8 = scmp.eq.s32.totalorder %s140_s13, 0  ;;  %s3904_s4 = sld [smem:[#allocation36_spill]] }
  0x43   : > { %s3967_s21 = smov (%p44_p4, %s3965_s21), 0  ;;  %s3907_s0 = sand.u32 1, %s3092_s27  }
  0x44   : > { %3905 = sst [smem:[#allocation27_spill]] %s3967_s21  ;;  %s46_s10 = ssub.s32 %s3120_s17, %s3967_s21 }
  0x45   : > { %s3339_s9 = scalar_select %p141_p8, %s3092_s27, %s143_s23  }
  0x46   : > { %s456_s2 = scalar_lea.vmem [#allocation12], %s3907_s0  ;;  %p47_p1 = scmp.eq.s32.totalorder %s46_s10, 0 }
  0x47   : > { %3906 = sst [smem:[#allocation28_spill]] %s3339_s9  ;;  %s463_s8 = sshll.u32 %s456_s2, 4  ;;  %s3345_s8 = int_to_ptr.vmem [resolvable:$true] %s463_s8 }
  0x48   : > { %s3334_s20 = scalar_lea.hbm %s3904_s4, %s2468_s24  ;;  %p3908_p12 = scmp.lt.s32.totalorder %s3124_s18, 4 }
  0x49   : > { %s3910_s13 = sadd.s32 1, %s3104_s30  ;;  %s2906_s23 = scalar_lea.hbm %s3334_s20, 16 }
  0x4a   : > { %p3349_p13 = pnand %p3908_p12, %p152_p6  ;;  %p2907_p3 = scmp.ne.s32.totalorder %s3334_s20, %s2906_s23 }
  0x4b   : > { %s3356_s12 = scalar_select %p47_p1, %s3104_s30, %s3910_s13  }
  0x4c   : > { %p3860_p5 = pneg %p3349_p13  ;;  %s2911_s10 = scalar_lea.hbm %s3904_s4, 32 }
  0x4d   : > { %3911 = sst [smem:[#allocation29_spill]] %s3356_s12  ;;  %p2912_p10 = scmp.lt.u32.totalorder %s3334_s20, %s3904_s4 }
  0x4e   : > { %p2909_p7 = pnand %p3860_p5, %p2907_p3  ;;  %p2913_p11 = scmp.lt.u32.totalorder %s2911_s10, %s2906_s23 }
  0x4f   : > { %p2915_p2 = scmp.lt.u32.totalorder %s2906_s23, %s3334_s20 }
  0x50   : > { %p2910_p9 = pneg %p2909_p7  ;;  %p2914_p0 = por %p2913_p11, %p2912_p10 }
  0x52   : > { %p2916_p6 = por %p2915_p2, %p2914_p0 }
  0x54   : > { %p2917_p4 = pnand %p2916_p6, %p2910_p9 }
  0x56   : > { %2920 = shalt.err (!%p2917_p4)
}
  0x57   : > { %s2921_s13 = scalar_lea.vmem %s3345_s8, 16  ;;  %s3127_s0 = smov [#allocation12]  }
  0x58   : > { %p2922_p8 = scmp.ne.s32.totalorder %s3345_s8, %s2921_s13  ;;  %s2926_s2 = sshll.u32 %s3127_s0, 4  ;;  %s2927_s2 = int_to_ptr.vmem [resolvable:$false] %s2926_s2 }
  0x59   : > { %s2928_s21 = scalar_lea.vmem %s2927_s2, 32  ;;  %p2929_p3 = scmp.lt.s32.totalorder %s3345_s8, %s2927_s2 }
  0x5a   : > { %p2924_p1 = pnand %p2922_p8, %p3860_p5  ;;  %p2930_p7 = scmp.lt.s32.totalorder %s2928_s21, %s2921_s13 }
  0x5c   : > { %p2925_p12 = pneg %p2924_p1  ;;  %p2931_p10 = por %p2930_p7, %p2929_p3 }
  0x5e   : > { %p2932_p11 = pnand %p2931_p10, %p2925_p12 }
  0x60   : > { %2935 = shalt.err (!%p2932_p11)
}
  0x61   : > { %2705 = dma.hbm_to_vmem [thread:$0]  (!%p3349_p13), %s3334_s20, 16, %s3345_s8, %s3288_s22  }
  0x62   : > { %s3385_s23 = sadd.s32 4294967295, %s3124_s18   ;;  %s2462_s10 = sadd.s32 4294967294, %s3124_s18  }
  0x63   : > { %p62_p9 = scmp.ne.s32.totalorder %s3100_s29, %s3096_s28  ;;  %p3866_p0 = scmp.eq.s32.totalorder %s3385_s23, 0 }
  0x64   : > { %p156_p2 = scmp.ne.s32.totalorder %s3088_s26, %s3084_s25  ;;  %p388_p6 = scmp.eq.s32.totalorder %s3385_s23, 3 }
  0x65   : > { %p3396_p4 = por %p3866_p0, %p62_p9  ;;  %p394_p8 = scmp.eq.s32.totalorder %s2462_s10, 3 }
  0x66   : > { %p3402_p1 = por %p156_p2, %p3866_p0  ;;  %p3914_p12 = scmp.ne.s32.totalorder %s3104_s30, %s3100_s29 }
  0x67   : > { %s3912_s19 = scalar_select %p3396_p4, 1, 0 }
  0x68   : > { %s3913_s8 = scalar_select %p3402_p1, 1, 0 }
  0x69   : > { %p3409_p3 = por %p388_p6, %p3914_p12  ;;  %p3413_p7 = por %p394_p8, %p62_p9 }
  0x6a   : > { %p2463_p10 = scmp.ge.s32.totalorder %s3124_s18, 1  ;;  %p401_p11 = scmp.lt.s32.totalorder %s3124_s18, 5 }
  0x6b   : > { %s3915_s20 = scalar_select %p3409_p3, 1, 0 }
  0x6c   : > { %s3917_s25 = scalar_select %p3413_p7, 1, 0 }
  0x6d   : > { %3916 = sst [smem:[#allocation30_spill]] %s3915_s20  ;;  %s3919_s13 = sand.u32 1, %s3092_s27  }
  0x6e   : > { %3918 = sst [smem:[#allocation31_spill]] %s3917_s25  ;;  %s2469_s0 = sshll.u32 %s3919_s13, 3 }
  0x6f   : > { %p3421_p5 = pnand %p2463_p10, %p401_p11  ;;  %s3128_s21 = smov [#allocation10]  }
  0x70   : > { %s417_s10 = sshll.u32 %s3128_s21, 4  ;;  %s2470_s4 = sshll.u32 %s3116_s16, 7  ;;  %s3425_s10 = int_to_ptr.vmem [resolvable:$true] %s417_s10 }
  0x71   : > { %s3920_s2 = scalar_select %p3421_p5, 1, 0 }
  0x72   : > { %p2695_p2 = pneg %p3421_p5  ;;  %s3921_s11 = sld [smem:[#allocation43_spill]] }
  0x73   : > { %s520_s13 = scalar_lea.vmem [#allocation13], %s2469_s0  ;;  %p3923_p8 = pneg %p3349_p13 }
  0x74   : > { %s527_s9 = sshll.u32 %s520_s13, 4  ;;  %p3437_p9 = pnand %p2695_p2, %p3866_p0  ;;  %s528_s9 = int_to_ptr.vmem [resolvable:$true] %s527_s9 }
  0x76   : > { %s3922_s27 = scalar_select %p3437_p9, 1, 0 }
  0x78   : > { %s3433_s30 = scalar_lea.hbm %s3921_s11, %s2470_s4  ;;  %s2941_s12 = scalar_lea.hbm %s3921_s11, 256 }
  0x79   : > { %s2936_s21 = scalar_lea.hbm %s3433_s30, 128  ;;  %p2942_p11 = scmp.lt.u32.totalorder %s3433_s30, %s3921_s11 }
  0x7a   : > { %p2937_p6 = scmp.ne.s32.totalorder %s3433_s30, %s2936_s21  ;;  %p2943_p7 = scmp.lt.u32.totalorder %s2941_s12, %s2936_s21 }
  0x7b   : > { %p2945_p0 = scmp.lt.u32.totalorder %s2936_s21, %s3433_s30 }
  0x7c   : > { %p2939_p12 = pnand %p2937_p6, %p3923_p8  ;;  %p2944_p2 = por %p2943_p7, %p2942_p11 }
  0x7e   : > { %p2940_p10 = pneg %p2939_p12  ;;  %p2946_p3 = por %p2945_p0, %p2944_p2 }
  0x80   : > { %p2947_p1 = pnand %p2946_p3, %p2940_p10 }
  0x82   : > { %2950 = shalt.err (!%p2947_p1)
}
  0x83   : > { %s2951_s0 = scalar_lea.vmem %s528_s9, 128  ;;  %p3924_p6 = pmov %p3923_p8 }
  0x84   : > { %p2952_p4 = scmp.ne.s32.totalorder %s528_s9, %s2951_s0  ;;  %s3129_s13 = smov [#allocation13]  }
  0x85   : > { %s2956_s4 = sshll.u32 %s3129_s13, 4  ;;  %s2957_s4 = int_to_ptr.vmem [resolvable:$false] %s2956_s4 }
  0x86   : > { %p2954_p8 = pnand %p2952_p4, %p3924_p6  ;;  %s2958_s17 = scalar_lea.vmem %s2957_s4, 256 }
  0x87   : > { %p2959_p5 = scmp.lt.s32.totalorder %s528_s9, %s2957_s4  ;;  %p2960_p9 = scmp.lt.s32.totalorder %s2958_s17, %s2951_s0 }
  0x88   : > { %p2955_p12 = pneg %p2954_p8 }
  0x89   : > { %p2961_p7 = por %p2960_p9, %p2959_p5 }
  0x8b   : > { %p2962_p11 = pnand %p2961_p7, %p2955_p12 }
  0x8d   : > { %2965 = shalt.err (!%p2962_p11)
}
  0x8e   : > { %2708 = dma.hbm_to_vmem [thread:$0]  (!%p3349_p13), %s3433_s30, 128, %s528_s9, %s3288_s22  }
  0x8f   : > { %s3925_s3 = sld [smem:[#allocation35_spill]]  ;;  %p3926_p4 = scmp.ne.s32.totalorder %s3922_s27, 0 }
  0x91   : > { %p2968_p1 = pneg %p3926_p4 }
  0x95   : > { %s2966_s21 = scalar_lea.hbm %s3925_s3, 16 }
  0x96   : > { %p2967_p0 = scmp.ne.s32.totalorder %s3925_s3, %s2966_s21  ;;  %p2973_p9 = scmp.lt.u32.totalorder %s2966_s21, %s3925_s3 }
  0x98   : > { %p2969_p3 = pnand %p2968_p1, %p2967_p0 }
  0x9a   : > { %p2970_p5 = pneg %p2969_p3 }
  0x9c   : > { %p2975_p10 = pnand %p2973_p9, %p2970_p5 }
  0x9e   : > { %2978 = shalt.err (!%p2975_p10)
}
  0x9f   : > { %s2979_s30 = scalar_lea.vmem %s3425_s10, 16  ;;  %s2986_s11 = scalar_lea.vmem %s3425_s10, 32 }
  0xa0   : > { %p2980_p13 = scmp.ne.s32.totalorder %s3425_s10, %s2979_s30  ;;  %p2987_p8 = scmp.lt.s32.totalorder %s3425_s10, %s3425_s10 }
  0xa1   : > { %p2988_p12 = scmp.lt.s32.totalorder %s2986_s11, %s2979_s30 }
  0xa2   : > { %p2982_p2 = pnand %p2980_p13, %p2968_p1 }
  0xa3   : > { %p2989_p7 = por %p2988_p12, %p2987_p8 }
  0xa4   : > { %p2983_p6 = pneg %p2982_p2 }
  0xa6   : > { %p2990_p11 = pnand %p2989_p7, %p2983_p6 }
  0xa8   : > { %2993 = shalt.err (!%p2990_p11)
}
  0xa9   : > { %2698 = dma.hbm_to_vmem [thread:$0]  (!%p3926_p4), %s3925_s3, 16, %s3425_s10, [#allocation11]  }
  0xaa   : > { %p3927_p0 = scmp.ne.s32.totalorder %s3920_s2, 0 }
  0xab   : > { %s546_s24 = sand.u32 (!%p3927_p0), 1, %s3385_s23   ;;  %s3872_s4 = sand.u32 (!%p3927_p0), 1, %s3100_s29  }
  0xac   : > { %544 = sbr.rel (%p3927_p0) target bundleno = 1751 (0x6d7), region = 72  ;;  %s3489_s17 = sshll.u32 (!%p3927_p0), %s3872_s4, 3 }
  0xad   : > { %s547_s16 = scalar_lea.sflag (!%p3927_p0), [#allocation8], %s546_s24  ;;  %p3928_p1 = scmp.ne.s32.totalorder (!%p3927_p0), %s3912_s19, 0 }
  0xb3   : > { %3067 = dma.done.wait (%p3928_p1), %s547_s16, 128  }
  0xb4   : > { %3069 = vsyncadd (%p3928_p1), %s547_s16, 4294967168  ;;  %p3929_p4 = scmp.eq.s32.totalorder %s3385_s23, 0 }
  0xb6   : > { %3071 = dma.done.wait (%p3929_p4), [#allocation11], 16   ;;  %p3930_p3 = pmov %p3929_p4 }
  0xb7   : > { %s561_s2 = sand.u32 1, %s3088_s26   ;;  %p3931_p5 = scmp.ne.s32.totalorder %s3913_s8, 0 }
  0xb8   : > { %3073 = vsyncadd (%p3930_p3), [#allocation11], 4294967280  ;;  %s3501_s10 = scalar_lea.vmem [#allocation12], %s561_s2 }
  0xb9   : > { %3075 = dma.done.wait (%p3931_p5), %s547_s16, 144  }
  0xba   : > { %3077 = vsyncadd (%p3931_p5), %s547_s16, 4294967152  ;;  %s3507_s19 = sshll.u32 %s561_s2, 3  ;;  %p660_p9 = scmp.lt.s32.totalorder %s3112_s15, 1 }
  0xbb   : > { %p664_p10 = scmp.lt.s32.totalorder %s3108_s14, 1  ;;  %s3932_s1 = sld [smem:[#allocation33_spill]] }
  0xbc   : > { %s661_s23 = scalar_select %p660_p9, %s3112_s15, 1 }
  0xbd   : > { %s665_s25 = scalar_select %p664_p10, %s3108_s14, 1 }
  0xbe   : > { %s2476_s21 = sshll.u32 %s661_s23, 3  ;;  %s3933_s5 = sld [smem:[#allocation37_spill]] }
  0xbf   : > { %s2537_s30 = sshll.u32 %s665_s25, 4  ;;  %s3934_s6 = sld [smem:[#allocation38_spill]] }
  0xc0   : > { %s2481_s2 = sshll.u32 %s665_s25, 2  ;;  %s2682_s4 = smul.u32 96, %s665_s25 }
  0xc1   : > { %s663_s13 = scalar_lea.vmem %s3932_s1, %s2476_s21  ;;  %s3935_s7 = sld [smem:[#allocation39_spill]] }
  0xc2   : > { %s3936_s0 = sld [smem:[#allocation40_spill]]  ;;  %s2539_s9 = sshll.u32 %s665_s25, 6 }
  0xc3   : > { %s2540_s18 = sshll.u32 %s665_s25, 5  ;;  %s571_s12 = scalar_lea.vmem [#allocation13], %s3507_s19 }
  0xc4   : > { %s3519_s22 = scalar_lea.vmem %s3933_s5, %s2537_s30  ;;  %s3937_s5 = sld [smem:[#allocation41_spill]] }
  0xc5   : > { %s3524_s16 = scalar_lea.vmem %s3934_s6, %s2537_s30  ;;  %s3938_s6 = sld [smem:[#allocation42_spill]] }
  0xc6   : > { %p2488_p13 = scmp.ne.s32.totalorder %s3108_s14, 0 }
  0xc7   : > { %s3529_s23 = scalar_lea.vmem %s3935_s7, %s2481_s2  ;;  %s3939_s7 = sld [smem:[#allocation44_spill]]  ;;  %v703_v0 = vld [vmem:[%s663_s13] sm:$0xff] (!%p2488_p13)  ;;  %v3130_v1 = vmov (!%p2488_p13), 0   ;;  %v2490_v6 = vld [vmem:[#allocation10] ss:$0 sm:$0xff] (!%p2488_p13)  ;;  %vm726_vm0 = vcmask (!%p2488_p13), 261120  }
  0xc8   : > { %s3534_s1 = scalar_lea.vmem %s3936_s0, %s2481_s2  ;;  %s3553_s2 = scalar_lea.vmem [#allocation14], %s3489_s17  ;;  %2811 = vset.pattern.permute.xlu0 (!%p2488_p13), %v3130_v1 }
  0xc9   : > { %701 = sbr.rel (%p2488_p13) target bundleno = 336 (0x150), region = 92  ;;  %707 = vperm.xlu0 (!%p2488_p13), %2811, %v703_v0   ;;  %s3941_s25 = scalar_lea.vmem (!%p2488_p13), [#allocation7], %s3489_s17 }
  0xca   : > { %s3539_s26 = scalar_lea.vmem %s3937_s5, %s2682_s4  ;;  %s3940_s4 = sld [smem:[#allocation34_spill]] (!%p2488_p13)  ;;  %v702_v4 = vld [vmem:[%s3941_s25] sm:$0xff] (!%p2488_p13) }
  0xcb   : > { %s3544_s28 = scalar_lea.vmem %s3938_s6, %s2539_s9 }
  0xcd   : > { %s3549_s20 = scalar_lea.vmem %s3939_s7, %s2540_s18 }
  0xd0   : > { %v2489_v2 = vld [vmem:[%s3940_s4] ss:$0 sm:$0xff] }
 0x148   : > { %v708_v3 = vpop.permute.xlu0 %707 }
 0x149   : > { %v716_v5 = vmul.f32 %v2489_v2, %v708_v3 }
 0x14b   : > { %v717_v7 = vadd.f32 %v716_v5, %v702_v4 }
 0x14d   : > { %v725_v8 = vadd.f32 %v2490_v6, %v717_v7 }
 0x14f   : > { %727 = vst.msk [vmem:[%s3553_s2] sm:$0xff] %vm726_vm0, %v725_v8 }
 0x150 PF: > { %vm731_vm1 = vcmask 261120   ;;  %v2812_v12 = vld [vmem:[%s3519_s22] sm:$0xff]   ;;  %v3131_v13 = vmov 0.0   ;;  %vm3132_vm2 = vmmov 0   ;;  %v2813_v14 = vld [vmem:[%s3519_s22 + $0x8] sm:$0xff]   ;;  %vm864_vm3 = vcmask 518144  }
 0x151   : > { %2582 = vmatprep.subr.bf16.mxu1 %v3131_v13  ;;  %2586 = vmatprep.mubr.msk.bf16.mxu1 %vm3132_vm2, %v3131_v13  ;;  %v2491_v19 = vld [vmem:[%s3501_s10] ss:$0 sm:$0xff]  ;;  %v2815_v24 = vld [vmem:[%s3524_s16 + $0x8] sm:$0xff]   ;;  %865 = vst.msk [vmem:[#allocation2] sm:$0x7] %vm864_vm3, %v3131_v13  ;;  %v3133_v35 = vmov 0   ;;  %v870_v38 = vlaneseq }
 0x152   : > { %2583 = vmatpush3.bf16.msra.mxu1 %v2812_v12  ;;  %v2814_v22 = vld [vmem:[%s3524_s16] sm:$0xff]   ;;  %v2819_v27 = vld [vmem:[%s3539_s26 + $0x8] ss:$12 sps:$4 sm:$0xff]   ;;  %v2826_v32 = vld [vmem:[%s3539_s26 + $0x30] ss:$12 sps:$4 sm:$0xff]   ;;  %1025 = vmatprep.mubr.bf16.mxu0 %v3133_v35  ;;  %vm866_vm4 = vcmask 523264  }
 0x153   : > { %2584 = vmatprep.subr.bf16.mxu1 %v3131_v13  ;;  %v2816_v25 = vld [vmem:[%s3539_s26 + $0x4] ss:$12 sps:$4 sm:$0xff]   ;;  %v2818_v26 = vld [vmem:[%s3539_s26] ss:$12 sps:$4 sm:$0xff]   ;;  %v2820_v28 = vld [vmem:[%s3539_s26 + $0x1c] ss:$12 sps:$4 sm:$0xff]  }
 0x154   : > { %993 = vmatprep.subr.bf16.mxu0 %v2816_v25  ;;  %v2822_v29 = vld [vmem:[%s3539_s26 + $0x18] ss:$12 sps:$4 sm:$0xff]   ;;  %v2823_v30 = vld [vmem:[%s3539_s26 + $0x20] ss:$12 sps:$4 sm:$0xff]   ;;  %v2830_v36 = vld [vmem:[%s3539_s26 + $0x48] ss:$12 sps:$4 sm:$0xff]  }
 0x155   : > { %994 = vmatpush1.bf16.msra.mxu0 %v2818_v26  ;;  %v2824_v31 = vld [vmem:[%s3539_s26 + $0x34] ss:$12 sps:$4 sm:$0xff]   ;;  %v2827_v33 = vld [vmem:[%s3539_s26 + $0x38] ss:$12 sps:$4 sm:$0xff]   ;;  %v2831_v37 = vld [vmem:[%s3539_s26 + $0x50] ss:$12 sps:$4 sm:$0xff]  }
 0x156   : > { %v3563_v9 = vld [vmem:[%s3553_s2] sm:$0xff]  ;;  %2585 = vmatpush3.bf16.msra.mxu1 %v2813_v14  ;;  %995 = vmatprep.subr.bf16.mxu0 %v2820_v28  ;;  %v3605_v39 = vshrl.u32 %v870_v38, 7  ;;  %v868_v45 = vld [vmem:[%s3529_s23] sm:$0xf]  ;;  %vm1074_vm5 = vcmask 64512   ;;  %vm1561_vm6 = vcmask 516096  }
 0x157   : > { %v730_v10 = vmul.f32 %v3563_v9, %v3563_v9  ;;  %2590 = vmatprep.subr.bf16.mxu1 %v3131_v13  ;;  %v2828_v34 = vld [vmem:[%s3539_s26 + $0x4c] ss:$12 sps:$4 sm:$0xff]   ;;  %v3627_v61 = vld [vmem:[%s3534_s1] sm:$0x7]  ;;  %s3942_s1 = sld [smem:[#allocation30_spill]]  ;;  %s2534_s7 = sshll.u32 %s3112_s15, 7 }
 0x158   : > { %v3609_v42 = vsub.s32 0, %v3605_v39  ;;  %v3612_v43 = vsub.s32 1, %v3605_v39  ;;  %v3616_v47 = vsub.s32 2, %v3605_v39  ;;  %v893_v50 = vsub.s32 3, %v3605_v39  ;;  %s2237_s26 = sshll.u32 %s3553_s2, 4  ;;  %s3943_s18 = sld [smem:[#allocation45_spill]]  ;;  %s3777_s26 = int_to_ptr.vmem [resolvable:$true] %s2237_s26 }
 0x159   : > { %v732_v11 = vsel %vm731_vm1, %v730_v10, 0.0  ;;  %996 = vmatpush1.bf16.msra.mxu0 %v2822_v29  ;;  %s3945_s15 = sand.u32 1, %s3100_s29   ;;  %s2994_s19 = scalar_lea.vmem %s3777_s26, 128 }
 0x15a   : > { %733 = vadd.xlane.f32.xlu0 %v732_v11  ;;  %997 = vmatprep.subr.bf16.mxu0 %v2824_v31  ;;  %v873_v48 = vrot.slane %v868_v45, %v3609_v42  ;;  %v880_v49 = vrot.slane %v868_v45, %v3612_v43  ;;  %v887_v51 = vrot.slane %v868_v45, %v3616_v47  ;;  %s2224_s10 = scalar_lea.sflag [#allocation9], %s3945_s15  ;;  %p2995_p2 = scmp.ne.s32.totalorder %s3777_s26, %s2994_s19 }
 0x15b   : > { %v894_v59 = vrot.slane %v868_v45, %v893_v50  ;;  %v900_v4 = vrot.slane %v3627_v61, %v3609_v42  ;;  %s3135_s13 = smov [#allocation14]  }
 0x15c   : > { %s2998_s22 = sshll.u32 %s3135_s13, 4  ;;  %s2999_s22 = int_to_ptr.vmem [resolvable:$false] %s2998_s22 }
 0x15d   : > { %998 = vmatpush1.bf16.msra.mxu0 %v2826_v32  ;;  %p3946_p6 = scmp.ne.s32.totalorder %s3942_s1, 0  ;;  %s3000_s16 = scalar_lea.vmem %s2999_s22, 256 }
 0x15e   : > { %999 = vmatprep.subr.bf16.mxu0 %v2828_v34  ;;  %s3775_s17 = scalar_lea.hbm %s3943_s18, %s2534_s7  ;;  %p3001_p7 = scmp.lt.s32.totalorder %s3777_s26, %s2999_s22 }
 0x15f   : > { %p2996_p8 = pnand %p2995_p2, %p3946_p6  ;;  %p3002_p11 = scmp.lt.s32.totalorder %s3000_s16, %s2994_s19 }
 0x161   : > { %1000 = vmatpush1.bf16.msra.mxu0 %v2830_v36  ;;  %p2997_p12 = pneg %p2996_p8  ;;  %p3003_p0 = por %p3002_p11, %p3001_p7 }
 0x162   : > { %2610 = vmatprep.subr.bf16.mxu0 %v3131_v13 }
 0x163   : > { %p3004_p1 = pnand %p3003_p0, %p2997_p12 }
 0x1e7   : > { %v734_v15 = vpop.xlane.xlu0 %733 }
 0x1e8   : > { %v736_v16 = vmul.f32 0.03125, %v734_v15  ;;  %v2832_v15 = vld [vmem:[%s3544_s28] sm:$0xff]  }
 0x1ea   : > { %v737_v17 = vadd.f32 1e-05, %v736_v16 }
 0x1ec   : > { %2844 = vrsqrt.f32 %v737_v17  ;;  %v2833_v17 = vld [vmem:[%s3544_s28 + $0x8] sm:$0xff]  }
 0x1f6   : > { %v2845_v18 = vpop.eup %2844 }
 0x1f7   : > { %v739_v20 = vmul.f32 %v2845_v18, %v3563_v9  ;;  %v2834_v18 = vld [vmem:[%s3544_s28 + $0x10] sm:$0xff]  }
 0x1f9   : > { %v746_v21 = vmul.f32 %v2491_v19, %v739_v20  ;;  %v2835_v19 = vld [vmem:[%s3544_s28 + $0x18] sm:$0xff]   ;;  %v2836_v20 = vld [vmem:[%s3544_s28 + $0x20] sm:$0xff]  }
 0x1fb   : > { %v747_v23 = vpack.c.bf16 %v746_v21, %v746_v21  ;;  %v2837_v21 = vld [vmem:[%s3544_s28 + $0x28] sm:$0xff]  }
 0x1fd   : > { %2587 = vmatmul.mubr.msk.bf16.vlgmr.msra.gmra.mrb[0].mxu1 %vm731_vm1, %v747_v23 }
 0x1fe   : > { %2591 = vmatpush3.bf16.msra.mxu1 %v2814_v22  ;;  %2594 = vmatprep.mubr.msk.bf16.mxu1 %vm3132_vm2, %v3131_v13  ;;  %v2838_v22 = vld [vmem:[%s3544_s28 + $0x30] sm:$0xff]  }
 0x1ff   : > { %2592 = vmatprep.subr.bf16.mxu1 %v3131_v13 }
 0x202   : > { %2593 = vmatpush3.bf16.msra.mxu1 %v2815_v24 }
 0x203   : > { %2598 = vmatprep.subr.bf16.mxu1 %v3131_v13 }
 0x205   : > { %2595 = vmatmul.mubr.msk.bf16.vlgmr.msra.gmra.mrb[4].mxu1 %vm731_vm1, %v747_v23  ;;  %v2839_v23 = vld [vmem:[%s3544_s28 + $0x38] sm:$0xff]  }
 0x206   : > { %2606 = vmatprep.mubr.msk.bf16.mxu1 %vm3132_vm2, %v3131_v13  ;;  %2599 = vmatpush3.bf16.msra.mxu1 %v2819_v27 }
 0x207   : > { %2600 = vmatprep.subr.bf16.mxu1 %v3131_v13 }
 0x20a   : > { %2601 = vmatpush3.bf16.msra.mxu1 %v2823_v30 }
 0x20b   : > { %2602 = vmatprep.subr.bf16.mxu1 %v3131_v13 }
 0x20e   : > { %2603 = vmatpush3.bf16.msra.mxu1 %v2827_v33 }
 0x20f   : > { %2604 = vmatprep.subr.bf16.mxu1 %v3131_v13 }
 0x212   : > { %2605 = vmatpush3.bf16.msra.mxu1 %v2831_v37  ;;  %v1351_v37 = vsub.s32 4, %v3605_v39 }
 0x213   : > { %2630 = vmatprep.subr.mxu1 %v3131_v13 }
 0x2d0   : > { %v801_v40 = vpop.f32.mrb[0].mxu1 }
 0x2d1   : > { %867 = vst.msk [vmem:[#allocation2 + $0x3] sm:$0xff] %vm866_vm4, %v801_v40  ;;  %v2588_v41 = vpop.f32.mrb[1].mxu1  ;;  %v1358_v40 = vsub.s32 5, %v3605_v39 }
 0x2d2   : > { %v804_v44 = vpop.f32.mrb[2].mxu1 }
 0x2d3   : > { %v2589_v46 = vpop.f32.mrb[3].mxu1  ;;  %v1365_v44 = vsub.s32 6, %v3605_v39 }
 0x2d4   : > { %v1372_v46 = vsub.s32 7, %v3605_v39 }
 0x2d8   : > { %v3622_v52 = vpop.f32.mrb[4].mxu1  ;;  %v869_v53 = vld [vmem:[#allocation2] sm:$0xff] }
 0x2d9   : > { %v876_v54 = vld [vmem:[#allocation2 + $0x1] sm:$0xff]  ;;  %v2596_v56 = vpop.f32.mrb[5].mxu1  ;;  %v874_v57 = vmul.f32 %v873_v48, %v869_v53 }
 0x2da   : > { %v883_v55 = vld [vmem:[#allocation2 + $0x2] sm:$0xff]  ;;  %v881_v58 = vmul.f32 %v880_v49, %v876_v54  ;;  %v860_v60 = vpop.f32.mrb[6].mxu1  ;;  %v1096_v49 = vrot.slane %v3627_v61, %v3612_v43 }
 0x2db   : > { %v890_v62 = vld [vmem:[#allocation2 + $0x3] sm:$0xff]  ;;  %v2597_v63 = vpop.f32.mrb[7].mxu1  ;;  %v888_v1 = vmul.f32 %v887_v51, %v883_v55 }
 0x2dc   : > { %v882_v0 = vadd.f32 %v881_v58, %v874_v57  ;;  %v895_v3 = vmul.f32 %v894_v59, %v890_v62  ;;  %v1194_v63 = vld [vmem:[%s571_s12] sm:$0xff] }
 0x2de   : > { %v889_v2 = vadd.f32 %v888_v1, %v882_v0  ;;  %v1195_v0 = vmul.f32 1.442695, %v1194_v63  ;;  %v3134_v1 = vmov 1966171168  }
 0x2e0   : > { %v896_v5 = vadd.f32 %v895_v3, %v889_v2  ;;  %v1202_v2 = vunpack.c.l.s4 %v3134_v1 }
 0x2e2   : > { %v901_v6 = vadd.f32 %v900_v4, %v896_v5  ;;  %v1203_v3 = vunpack.c.0.s8 %v1202_v2 }
 0x2e4   : > { %v902_v7 = vsub.f32 0.0, %v901_v6 }
 0x2e6   : > { %v903_v8 = vmul.f32 1.442695, %v902_v7 }
 0x2e8   : > { %2846 = vpow2.f32 %v903_v8  ;;  %v1206_v8 = vsub.s32 %v1203_v3, %v3605_v39 }
 0x2f2   : > { %v2847_v10 = vpop.eup %2846 }
 0x2f3   : > { %v905_v11 = vadd.f32 1.0, %v2847_v10 }
 0x2f5   : > { %2848 = vrcp.f32 %v905_v11 }
 0x2ff   : > { %v2849_v12 = vpop.eup %2848 }
 0x300   : > { %v3631_v14 = vmul.f32 %v2849_v12, %v901_v6 }
 0x302   : > { %v909_v16 = vpack.c.bf16 %v3631_v14, %v3631_v14 }
 0x304   : > { %2510 = vmatmul.mubr.msk.bf16.vlgmr.msra.gmra.mrb[0].mxu0 %vm866_vm4, %v909_v16  ;;  %2607 = vmatmul.mubr.msk.bf16.vlgmr.msra.gmra.mrb[8].mxu1 %vm866_vm4, %v909_v16 }
 0x305   : > { %2611 = vmatpush3.bf16.msra.mxu0 %v2832_v15  ;;  %2626 = vmatprep.mubr.msk.bf16.mxu0 %vm3132_vm2, %v3131_v13 }
 0x306   : > { %2612 = vmatprep.subr.bf16.mxu0 %v3131_v13  ;;  %2632 = vmatprep.mubr.msk.f32.mxu1 %vm3132_vm2, %v3131_v13 }
 0x309   : > { %2613 = vmatpush3.bf16.msra.mxu0 %v2833_v17 }
 0x30a   : > { %2614 = vmatprep.subr.bf16.mxu0 %v3131_v13 }
 0x30d   : > { %2615 = vmatpush3.bf16.msra.mxu0 %v2834_v18 }
 0x30e   : > { %2616 = vmatprep.subr.bf16.mxu0 %v3131_v13 }
 0x311   : > { %2617 = vmatpush3.bf16.msra.mxu0 %v2835_v19 }
 0x312   : > { %2618 = vmatprep.subr.bf16.mxu0 %v3131_v13 }
 0x315   : > { %2619 = vmatpush3.bf16.msra.mxu0 %v2836_v20 }
 0x316   : > { %2620 = vmatprep.subr.bf16.mxu0 %v3131_v13 }
 0x319   : > { %2621 = vmatpush3.bf16.msra.mxu0 %v2837_v21 }
 0x31a   : > { %2622 = vmatprep.subr.bf16.mxu0 %v3131_v13 }
 0x31d   : > { %2623 = vmatpush3.bf16.msra.mxu0 %v2838_v22 }
 0x31e   : > { %2624 = vmatprep.subr.bf16.mxu0 %v3131_v13 }
 0x321   : > { %2625 = vmatpush3.bf16.msra.mxu0 %v2839_v23 }
 0x322   : > { %2670 = vmatprep.subr.bf16.mxu0 %v3131_v13 }
 0x3d7   : > { %v1027_v24 = vpop.f32.mrb[0].mxu0  ;;  %v1068_v25 = vpop.f32.mrb[8].mxu1 }
 0x3d8   : > { %v1076_v26 = vpack.c.bf16 %v1027_v24, %v1027_v24  ;;  %1075 = vst.msk [vmem:[#allocation5] sm:$0xff] %vm1074_vm5, %v1068_v25  ;;  %v1029_v27 = vpop.f32.mrb[1].mxu0  ;;  %v2608_v28 = vpop.f32.mrb[9].mxu1 }
 0x3d9   : > { %v1031_v29 = vpop.f32.mrb[2].mxu0  ;;  %v1071_v30 = vpop.f32.mrb[10].mxu1  ;;  %v1331_v31 = vrot.slane %v1029_v27, %v3612_v43  ;;  %v1324_v32 = vrot.slane %v1029_v27, %v3609_v42  ;;  %v1338_v35 = vrot.slane %v1029_v27, %v3616_v47  ;;  %v1345_v36 = vrot.slane %v1029_v27, %v893_v50 }
 0x3da   : > { %v1032_v33 = vpop.f32.mrb[3].mxu0  ;;  %v2609_v34 = vpop.f32.mrb[11].mxu1  ;;  %2627 = vmatmul.mubr.bf16.vlgmr.msra.gmra.mrb[4].mxu0 %v1076_v26  ;;  %v1352_v38 = vrot.slane %v1029_v27, %v1351_v37  ;;  %v1359_v41 = vrot.slane %v1029_v27, %v1358_v40  ;;  %v1366_v45 = vrot.slane %v1029_v27, %v1365_v44  ;;  %v1373_v48 = vrot.slane %v1029_v27, %v1372_v46 }
 0x3db   : > { %1333 = vbcast.lane.b32.xlu1 %v1331_v31, 256  ;;  %1326 = vbcast.lane.b32.xlu0 %v1324_v32, 256 }
 0x3dc   : > { %2678 = vmatprep.mubr.msk.bf16.mxu0 %vm3132_vm2, %v3131_v13 }
 0x3df   : > { %1340 = vbcast.lane.b32.xlu1 %v1338_v35, 256 }
 0x3e3   : > { %1347 = vbcast.lane.b32.xlu1 %v1345_v36, 256 }
 0x3e7   : > { %1354 = vbcast.lane.b32.xlu1 %v1352_v38, 256 }
 0x3eb   : > { %1361 = vbcast.lane.b32.xlu1 %v1359_v41, 256 }
 0x3ef   : > { %1368 = vbcast.lane.b32.xlu1 %v1366_v45, 256 }
 0x3f3   : > { %1375 = vbcast.lane.b32.xlu1 %v1373_v48, 256 }
 0x44d   : > { %v3671_v60 = vpop.permute.xlu1 %1333 }
 0x451   : > { %v3675_v43 = vpop.permute.xlu1 %1340 }
 0x455   : > { %v3677_v5 = vpop.permute.xlu1 %1347 }
 0x459   : > { %v3681_v17 = vpop.permute.xlu1 %1354 }
 0x45d   : > { %v1362_v35 = vpop.permute.xlu1 %1361 }
 0x461   : > { %v1369_v2 = vpop.permute.xlu1 %1368 }
 0x4ad   : > { %v1179_v50 = vpop.f32.mrb[4].mxu0 }
 0x4ae   : > { %v1180_v51 = vadd.f32 %v1179_v50, %v1096_v49  ;;  %v2628_v53 = vpop.f32.mrb[5].mxu0 }
 0x4af   : > { %v1182_v54 = vpop.f32.mrb[6].mxu0 }
 0x4b0   : > { %v1186_v55 = vand.u32 2147483647, %v1180_v51  ;;  %v2629_v56 = vpop.f32.mrb[7].mxu0  ;;  %v1185_v6 = vmax.f32 %v1180_v51, 0.0 }
 0x4b2   : > { %v1187_v57 = vsub.f32 0.0, %v1186_v55 }
 0x4b4   : > { %v1188_v58 = vmul.f32 1.442695, %v1187_v57 }
 0x4b6   : > { %2850 = vpow2.f32 %v1188_v58 }
 0x4c0   : > { %v2851_v59 = vpop.eup %2850 }
 0x4c1   : > { %v1190_v62 = vadd.f32 1.0, %v2851_v59 }
 0x4c3   : > { %2852 = vlog2.f32 %v1190_v62 }
 0x4c4   : > { %2854 = vpow2.f32 %v1195_v0 }
 0x4cd   : > { %v2853_v4 = vpop.eup %2852 }
 0x4ce   : > { %v1192_v7 = vmul.f32 0.6931472, %v2853_v4  ;;  %v2855_v11 = vpop.eup %2854 }
 0x4cf   : > { %v1197_v22 = vsub.f32 0.0, %v2855_v11 }
 0x4d0   : > { %v1193_v10 = vadd.f32 %v1192_v7, %v1185_v6 }
 0x4d2   : > { %v1198_v12 = vmul.f32 %v1193_v10, %v3631_v14  ;;  %v1200_v15 = vcombine.high %v1193_v10, %v1193_v10  ;;  %v1207_v16 = vrot.slane %v1193_v10, %v1206_v8 }
 0x4d4   : > { %v1214_v18 = vrot.slane %v1200_v15, %v1206_v8  ;;  %v1215_v19 = vcombine.high %v1207_v16, %v1207_v16  ;;  %v1223_v20 = vrot.slane %v1207_v16, %v1206_v8  ;;  %v1378_v21 = vcombine.high %v1198_v12, %v1198_v12 }
 0x4d5   : > { %v1385_v23 = vrot.slane %v1198_v12, %v1206_v8 }
 0x4d6   : > { %v1216_v24 = vcombine.high %v1214_v18, %v1214_v18  ;;  %v1230_v25 = vrot.slane %v1214_v18, %v1206_v8  ;;  %v1237_v26 = vrot.slane %v1215_v19, %v1206_v8  ;;  %v1245_v27 = vcombine.high %v1223_v20, %v1223_v20 }
 0x4d7   : > { %v1252_v39 = vrot.slane %v1223_v20, %v3609_v42  ;;  %v1392_v28 = vrot.slane %v1378_v21, %v1206_v8  ;;  %v1393_v29 = vcombine.high %v1385_v23, %v1385_v23  ;;  %v1401_v30 = vrot.slane %v1385_v23, %v1206_v8  ;;  %v1327_v21 = vpop.permute.xlu0 %1326 }
 0x4d8   : > { %v1244_v31 = vrot.slane %v1216_v24, %v1206_v8  ;;  %v1246_v32 = vcombine.high %v1230_v25, %v1230_v25  ;;  %v1247_v33 = vcombine.high %v1237_v26, %v1237_v26  ;;  %v1256_v34 = vrot.slane %v1237_v26, %v3609_v42 }
 0x4d9   : > { %v1260_v36 = vrot.slane %v1245_v27, %v3609_v42  ;;  %v1268_v37 = vrot.slane %v1230_v25, %v3609_v42  ;;  %v1289_v38 = vmul.f32 %v1252_v39, %v1197_v22  ;;  %v1394_v40 = vcombine.high %v1392_v28, %v1392_v28  ;;  %v1376_v27 = vpop.permute.xlu1 %1375 }
 0x4da   : > { %v1248_v41 = vcombine.high %v1244_v31, %v1244_v31  ;;  %v1264_v44 = vrot.slane %v1247_v33, %v3609_v42  ;;  %v1272_v45 = vrot.slane %v1244_v31, %v3609_v42  ;;  %v1276_v46 = vrot.slane %v1246_v32, %v3609_v42 }
 0x4db   : > { %v1290_v48 = vmul.f32 %v1256_v34, %v1197_v22  ;;  %v1291_v49 = vmul.f32 %v1260_v36, %v1197_v22  ;;  %v1293_v50 = vmul.f32 %v1268_v37, %v1197_v22  ;;  %v1297_v51 = vmul.f32 1.442695, %v1289_v38 }
 0x4dc   : > { %v1280_v53 = vrot.slane %v1248_v41, %v3609_v42  ;;  %v1292_v54 = vmul.f32 %v1264_v44, %v1197_v22  ;;  %v1294_v55 = vmul.f32 %v1272_v45, %v1197_v22  ;;  %v1295_v56 = vmul.f32 %v1276_v46, %v1197_v22  ;;  %v1487_v44 = vld [vmem:[#allocation5] sm:$0x1] }
 0x4dd   : > { %2856 = vpow2.f32 %v1297_v51  ;;  %v1299_v57 = vmul.f32 1.442695, %v1290_v48  ;;  %v1301_v58 = vmul.f32 1.442695, %v1291_v49  ;;  %v1305_v59 = vmul.f32 1.442695, %v1293_v50 }
 0x4de   : > { %v1296_v62 = vmul.f32 %v1280_v53, %v1197_v22  ;;  %v1303_v63 = vmul.f32 1.442695, %v1292_v54  ;;  %v1307_v0 = vmul.f32 1.442695, %v1294_v55  ;;  %v1309_v1 = vmul.f32 1.442695, %v1295_v56 }
 0x4df   : > { %2858 = vpow2.f32 %v1299_v57  ;;  %v1408_v3 = vrot.slane %v1392_v28, %v1206_v8  ;;  %v1415_v4 = vrot.slane %v1393_v29, %v1206_v8  ;;  %v1422_v6 = vrot.slane %v1394_v40, %v1206_v8  ;;  %v1569_v50 = vld [vmem:[#allocation5 + $0x1] sm:$0x1]  ;;  %v1650_v56 = vld [vmem:[#allocation5 + $0x2] sm:$0x1] }
 0x4e0   : > { %2860 = vpow2.f32 %v1301_v58  ;;  %v1311_v7 = vmul.f32 1.442695, %v1296_v62  ;;  %v1423_v10 = vcombine.high %v1401_v30, %v1401_v30  ;;  %v1430_v11 = vrot.slane %v1401_v30, %v3609_v42 }
 0x4e1   : > { %2862 = vpow2.f32 %v1303_v63  ;;  %v1424_v12 = vcombine.high %v1408_v3, %v1408_v3  ;;  %v1425_v15 = vcombine.high %v1415_v4, %v1415_v4  ;;  %v1426_v16 = vcombine.high %v1422_v6, %v1422_v6  ;;  %v1731_v63 = vld [vmem:[#allocation5 + $0x3] sm:$0x1] }
 0x4e2   : > { %2864 = vpow2.f32 %v1305_v59  ;;  %v1434_v18 = vrot.slane %v1415_v4, %v3609_v42  ;;  %v1438_v19 = vrot.slane %v1423_v10, %v3609_v42  ;;  %v1446_v20 = vrot.slane %v1408_v3, %v3609_v42  ;;  %v1812_v4 = vld [vmem:[#allocation5 + $0x4] sm:$0x1] }
 0x4e3   : > { %2866 = vpow2.f32 %v1307_v0  ;;  %v1442_v8 = vrot.slane %v1425_v15, %v3609_v42  ;;  %v1450_v22 = vrot.slane %v1422_v6, %v3609_v42  ;;  %v1454_v23 = vrot.slane %v1424_v12, %v3609_v42  ;;  %v1893_v12 = vld [vmem:[#allocation5 + $0x5] sm:$0x1] }
 0x4e4   : > { %2868 = vpow2.f32 %v1309_v1  ;;  %v1458_v24 = vrot.slane %v1426_v16, %v3609_v42  ;;  %v1467_v25 = vmul.f32 %v1430_v11, %v1327_v21  ;;  %v1468_v26 = vmul.f32 %v1434_v18, %v3671_v60 }
 0x4e5   : > { %2870 = vpow2.f32 %v1311_v7  ;;  %v1469_v39 = vmul.f32 %v1438_v19, %v3675_v43  ;;  %v1470_v28 = vmul.f32 %v1442_v8, %v3677_v5  ;;  %v1471_v29 = vmul.f32 %v1446_v20, %v3681_v17  ;;  %v1974_v20 = vld [vmem:[#allocation5 + $0x6] sm:$0x1] }
 0x4e6   : > { %v1472_v30 = vmul.f32 %v1450_v22, %v1362_v35  ;;  %v1473_v31 = vmul.f32 %v1454_v23, %v1369_v2  ;;  %v1474_v32 = vmul.f32 %v1458_v24, %v1376_v27  ;;  %1475 = vst.msk [vmem:[#allocation4] sm:$0xff] %vm866_vm4, %v1467_v25  ;;  %1476 = vst.msk [vmem:[#allocation4 + $0x8] sm:$0xff] %vm866_vm4, %v1468_v26  ;;  %v2055_v23 = vld [vmem:[#allocation5 + $0x7] sm:$0x1]  ;;  %v2840_v24 = vld [vmem:[%s3549_s20] sm:$0xff]  }
 0x4e7   : > { %v2857_v33 = vpop.eup %2856  ;;  %1477 = vst.msk [vmem:[#allocation4 + $0x10] sm:$0xff] %vm866_vm4, %v1469_v39  ;;  %1478 = vst.msk [vmem:[#allocation4 + $0x18] sm:$0xff] %vm866_vm4, %v1470_v28  ;;  %2671 = vmatpush3.bf16.msra.mxu0 %v2840_v24  ;;  %v2841_v25 = vld [vmem:[%s3549_s20 + $0x8] sm:$0xff]   ;;  %v2842_v26 = vld [vmem:[%s3549_s20 + $0x10] sm:$0xff]   ;;  %v2137_v39 = vsub.f32 0.0, %v3622_v52 }
 0x4e8   : > { %1479 = vst.msk [vmem:[#allocation4 + $0x20] sm:$0xff] %vm866_vm4, %v1471_v29  ;;  %1313 = vst.msk [vmem:[#allocation3] sm:$0xff] %vm866_vm4, %v2857_v33  ;;  %2672 = vmatprep.subr.bf16.mxu0 %v3131_v13  ;;  %v2843_v27 = vld [vmem:[%s3549_s20 + $0x18] sm:$0xff]   ;;  %s3944_s20 = smov %s3943_s18 }
 0x4e9   : > { %1480 = vst.msk [vmem:[#allocation4 + $0x28] sm:$0xff] %vm866_vm4, %v1472_v30  ;;  %1481 = vst.msk [vmem:[#allocation4 + $0x30] sm:$0xff] %vm866_vm4, %v1473_v31  ;;  %v2859_v42 = vpop.eup %2858  ;;  %v2138_v30 = vmul.f32 1.442695, %v2137_v39 }
 0x4ea   : > { %1482 = vst.msk [vmem:[#allocation4 + $0x38] sm:$0xff] %vm866_vm4, %v1474_v32  ;;  %v2861_v60 = vpop.eup %2860  ;;  %1314 = vst.msk [vmem:[#allocation3 + $0x8] sm:$0xff] %vm866_vm4, %v2859_v42 }
 0x4eb   : > { %v2863_v43 = vpop.eup %2862  ;;  %1315 = vst.msk [vmem:[#allocation3 + $0x10] sm:$0xff] %vm866_vm4, %v2861_v60  ;;  %2673 = vmatpush3.bf16.msra.mxu0 %v2841_v25  ;;  %2872 = vpow2.f32 %v2138_v30 }
 0x4ec   : > { %v2865_v5 = vpop.eup %2864  ;;  %1316 = vst.msk [vmem:[#allocation3 + $0x18] sm:$0xff] %vm866_vm4, %v2863_v43  ;;  %2674 = vmatprep.subr.bf16.mxu0 %v3131_v13 }
 0x4ed   : > { %v2867_v17 = vpop.eup %2866  ;;  %1317 = vst.msk [vmem:[#allocation3 + $0x20] sm:$0xff] %vm866_vm4, %v2865_v5  ;;  %v1485_v38 = vld [vmem:[#allocation4] sm:$0xff]  ;;  %v1567_v46 = vld [vmem:[#allocation4 + $0x8] sm:$0xff] }
 0x4ee   : > { %v2869_v34 = vpop.eup %2868  ;;  %1318 = vst.msk [vmem:[#allocation3 + $0x28] sm:$0xff] %vm866_vm4, %v2867_v17  ;;  %v1648_v53 = vld [vmem:[#allocation4 + $0x10] sm:$0xff]  ;;  %v1729_v58 = vld [vmem:[#allocation4 + $0x18] sm:$0xff] }
 0x4ef   : > { %v2871_v35 = vpop.eup %2870  ;;  %1319 = vst.msk [vmem:[#allocation3 + $0x30] sm:$0xff] %vm866_vm4, %v2869_v34  ;;  %v1483_v36 = vld [vmem:[#allocation3] sm:$0xff]  ;;  %2675 = vmatpush3.bf16.msra.mxu0 %v2842_v26 }
 0x4f0   : > { %1320 = vst.msk [vmem:[#allocation3 + $0x38] sm:$0xff] %vm866_vm4, %v2871_v35  ;;  %v1484_v37 = vmul.f32 0.0, %v1483_v36  ;;  %v1810_v1 = vld [vmem:[#allocation4 + $0x20] sm:$0xff]  ;;  %v1891_v7 = vld [vmem:[#allocation4 + $0x28] sm:$0xff]  ;;  %v1972_v16 = vld [vmem:[#allocation4 + $0x30] sm:$0xff]  ;;  %2676 = vmatprep.subr.bf16.mxu0 %v3131_v13 }
 0x4f1   : > { %v1564_v41 = vld [vmem:[#allocation3 + $0x8] sm:$0xff]  ;;  %v2053_v8 = vld [vmem:[#allocation4 + $0x38] sm:$0xff] }
 0x4f2   : > { %v1486_v40 = vadd.f32 %v1485_v38, %v1484_v37  ;;  %v1645_v49 = vld [vmem:[#allocation3 + $0x10] sm:$0xff] }
 0x4f3   : > { %v1726_v55 = vld [vmem:[#allocation3 + $0x18] sm:$0xff]  ;;  %2677 = vmatpush3.bf16.msra.mxu0 %v2843_v27 }
 0x4f4   : > { %2631 = vmatpush3.msra.mxu1 %v1486_v40  ;;  %v1565_v45 = vmul.f32 %v1564_v41, %v1486_v40  ;;  %v1807_v62 = vld [vmem:[#allocation3 + $0x20] sm:$0xff] }
 0x4f5   : > { %2633 = vmatmul.mubr.msk.f32.vlgmr.msra.gmra.mrb[12].mxu1 %vm1074_vm5, %v1487_v44  ;;  %2635 = vmatprep.subr.mxu1 %v3131_v13  ;;  %v1888_v3 = vld [vmem:[#allocation3 + $0x28] sm:$0xff]  ;;  %v2873_v5 = vpop.eup %2872  ;;  %v2134_v44 = vrot.slane %v3627_v61, %v3616_v47 }
 0x4f6   : > { %v1568_v48 = vadd.f32 %v1567_v46, %v1565_v45  ;;  %2637 = vmatprep.mubr.msk.f32.mxu1 %vm3132_vm2, %v3131_v13  ;;  %v1969_v11 = vld [vmem:[#allocation3 + $0x30] sm:$0xff]  ;;  %v2140_v34 = vadd.f32 1.0, %v2873_v5 }
 0x4f7   : > { %v2050_v19 = vld [vmem:[#allocation3 + $0x38] sm:$0xff]  ;;  %v2135_v46 = vmul.f32 %v2134_v44, %v3631_v14 }
 0x4f8   : > { %2636 = vmatpush3.msra.mxu1 %v1568_v48  ;;  %v1646_v51 = vmul.f32 %v1645_v49, %v1568_v48  ;;  %2874 = vrcp.f32 %v2140_v34 }
 0x4f9   : > { %2638 = vmatmul.mubr.msk.f32.vlgmr.msra.gmra.mrb[14].mxu1 %vm1074_vm5, %v1569_v50  ;;  %2640 = vmatprep.subr.mxu1 %v3131_v13 }
 0x4fa   : > { %v1649_v54 = vadd.f32 %v1648_v53, %v1646_v51  ;;  %2642 = vmatprep.mubr.msk.f32.mxu1 %vm3132_vm2, %v3131_v13 }
 0x4fc   : > { %2641 = vmatpush3.msra.mxu1 %v1649_v54  ;;  %v1727_v57 = vmul.f32 %v1726_v55, %v1649_v54 }
 0x4fd   : > { %2643 = vmatmul.mubr.msk.f32.vlgmr.msra.gmra.mrb[16].mxu1 %vm1074_vm5, %v1650_v56  ;;  %2645 = vmatprep.subr.mxu1 %v3131_v13 }
 0x4fe   : > { %v1730_v59 = vadd.f32 %v1729_v58, %v1727_v57  ;;  %2647 = vmatprep.mubr.msk.f32.mxu1 %vm3132_vm2, %v3131_v13 }
 0x500   : > { %2646 = vmatpush3.msra.mxu1 %v1730_v59  ;;  %v1808_v0 = vmul.f32 %v1807_v62, %v1730_v59 }
 0x501   : > { %2648 = vmatmul.mubr.msk.f32.vlgmr.msra.gmra.mrb[18].mxu1 %vm1074_vm5, %v1731_v63  ;;  %2650 = vmatprep.subr.mxu1 %v3131_v13 }
 0x502   : > { %v1811_v2 = vadd.f32 %v1810_v1, %v1808_v0  ;;  %2652 = vmatprep.mubr.msk.f32.mxu1 %vm3132_vm2, %v3131_v13  ;;  %v2875_v45 = vpop.eup %2874 }
 0x503   : > { %v2143_v49 = vmul.f32 %v2875_v45, %v3622_v52 }
 0x504   : > { %2651 = vmatpush3.msra.mxu1 %v1811_v2  ;;  %v1889_v6 = vmul.f32 %v1888_v3, %v1811_v2 }
 0x505   : > { %2653 = vmatmul.mubr.msk.f32.vlgmr.msra.gmra.mrb[20].mxu1 %vm1074_vm5, %v1812_v4  ;;  %2655 = vmatprep.subr.mxu1 %v3131_v13 }
 0x506   : > { %v1892_v10 = vadd.f32 %v1891_v7, %v1889_v6  ;;  %2657 = vmatprep.mubr.msk.f32.mxu1 %vm3132_vm2, %v3131_v13 }
 0x508   : > { %2656 = vmatpush3.msra.mxu1 %v1892_v10  ;;  %v1970_v15 = vmul.f32 %v1969_v11, %v1892_v10 }
 0x509   : > { %2658 = vmatmul.mubr.msk.f32.vlgmr.msra.gmra.mrb[22].mxu1 %vm1074_vm5, %v1893_v12  ;;  %2660 = vmatprep.subr.mxu1 %v3131_v13 }
 0x50a   : > { %v1973_v18 = vadd.f32 %v1972_v16, %v1970_v15  ;;  %2662 = vmatprep.mubr.msk.f32.mxu1 %vm3132_vm2, %v3131_v13 }
 0x50c   : > { %2661 = vmatpush3.msra.mxu1 %v1973_v18  ;;  %v2051_v21 = vmul.f32 %v2050_v19, %v1973_v18 }
 0x50d   : > { %2663 = vmatmul.mubr.msk.f32.vlgmr.msra.gmra.mrb[24].mxu1 %vm1074_vm5, %v1974_v20  ;;  %2665 = vmatprep.subr.mxu1 %v3131_v13 }
 0x50e   : > { %v2054_v22 = vadd.f32 %v2053_v8, %v2051_v21  ;;  %2667 = vmatprep.mubr.msk.f32.mxu1 %vm3132_vm2, %v3131_v13 }
 0x510   : > { %2666 = vmatpush3.msra.mxu1 %v2054_v22 }
 0x511   : > { %2668 = vmatmul.mubr.msk.f32.vlgmr.msra.gmra.mrb[26].mxu1 %vm1074_vm5, %v2055_v23 }
 0x5c8   : > { %v1557_v28 = vpop.f32.mrb[12].mxu1 }
 0x5c9   : > { %1562 = vst.msk [vmem:[#allocation6] sm:$0x1] %vm1561_vm6, %v1557_v28  ;;  %v2634_v29 = vpop.f32.mrb[13].mxu1 }
 0x5cc   : > { %v1639_v31 = vpop.f32.mrb[14].mxu1 }
 0x5cd   : > { %1643 = vst.msk [vmem:[#allocation6 + $0x1] sm:$0x1] %vm1561_vm6, %v1639_v31  ;;  %v2639_v32 = vpop.f32.mrb[15].mxu1 }
 0x5d0   : > { %v1720_v33 = vpop.f32.mrb[16].mxu1 }
 0x5d1   : > { %1724 = vst.msk [vmem:[#allocation6 + $0x2] sm:$0x1] %vm1561_vm6, %v1720_v33  ;;  %v2644_v42 = vpop.f32.mrb[17].mxu1 }
 0x5d4   : > { %v1801_v60 = vpop.f32.mrb[18].mxu1 }
 0x5d5   : > { %1805 = vst.msk [vmem:[#allocation6 + $0x3] sm:$0x1] %vm1561_vm6, %v1801_v60  ;;  %v2649_v13 = vpop.f32.mrb[19].mxu1 }
 0x5d8   : > { %v1882_v43 = vpop.f32.mrb[20].mxu1 }
 0x5d9   : > { %1886 = vst.msk [vmem:[#allocation6 + $0x4] sm:$0x1] %vm1561_vm6, %v1882_v43  ;;  %v2654_v17 = vpop.f32.mrb[21].mxu1 }
 0x5dc   : > { %v1963_v35 = vpop.f32.mrb[22].mxu1 }
 0x5dd   : > { %1967 = vst.msk [vmem:[#allocation6 + $0x5] sm:$0x1] %vm1561_vm6, %v1963_v35  ;;  %v2659_v36 = vpop.f32.mrb[23].mxu1 }
 0x5e0   : > { %v2044_v37 = vpop.f32.mrb[24].mxu1 }
 0x5e1   : > { %2048 = vst.msk [vmem:[#allocation6 + $0x6] sm:$0x1] %vm1561_vm6, %v2044_v37  ;;  %v2664_v38 = vpop.f32.mrb[25].mxu1 }
 0x5e4   : > { %v2125_v40 = vpop.f32.mrb[26].mxu1 }
 0x5e5   : > { %2129 = vst.msk [vmem:[#allocation6 + $0x7] sm:$0x1] %vm1561_vm6, %v2125_v40  ;;  %v2669_v41 = vpop.f32.mrb[27].mxu1 }
 0x5ec   : > { %v2130_v48 = vld [vmem:[#allocation6] sm:$0xff] }
 0x5ed   : > { %v2136_v50 = vadd.f32 %v2135_v46, %v2130_v48 }
 0x5ef   : > { %v2144_v51 = vmul.f32 %v2143_v49, %v2136_v50 }
 0x5f1   : > { %v2145_v53 = vpack.c.bf16 %v2144_v51, %v2144_v51 }
 0x5f3   : > { %2679 = vmatmul.mubr.msk.bf16.vlgmr.msra.gmra.mrb[8].mxu0 %vm866_vm4, %v2145_v53 }
 0x6c6   : > { %v2215_v54 = vpop.f32.mrb[8].mxu0 }
 0x6c7   : > { %v2221_v55 = vadd.f32 %v2215_v54, %v3563_v9  ;;  %v2680_v47 = vpop.f32.mrb[9].mxu0 }
 0x6c8   : > { %v2218_v52 = vpop.f32.mrb[10].mxu0 }
 0x6c9   : > { %2222 = vst.msk [vmem:[%s3553_s2] sm:$0xff] %vm731_vm1, %v2221_v55  ;;  %v2681_v61 = vpop.f32.mrb[11].mxu0 }
 0x6ca   : > { %3007 = shalt.err (!%p3004_p1)
}
 0x6cb   : > { %s3008_s23 = scalar_lea.hbm %s3775_s17, 128  ;;  %s3012_s8 = scalar_lea.hbm %s3944_s20, 256 }
 0x6cc   : > { %p3009_p4 = scmp.ne.s32.totalorder %s3775_s17, %s3008_s23  ;;  %p3013_p9 = scmp.lt.u32.totalorder %s3775_s17, %s3944_s20 }
 0x6cd   : > { %p3014_p10 = scmp.lt.u32.totalorder %s3012_s8, %s3008_s23  ;;  %p3016_p2 = scmp.lt.u32.totalorder %s3008_s23, %s3775_s17 }
 0x6ce   : > { %p3010_p3 = pnand %p3009_p4, %p3946_p6 }
 0x6cf   : > { %p3015_p13 = por %p3014_p10, %p3013_p9 }
 0x6d0   : > { %p3011_p5 = pneg %p3010_p3 }
 0x6d1   : > { %p3017_p8 = por %p3016_p2, %p3015_p13 }
 0x6d3   : > { %p3018_p12 = pnand %p3017_p8, %p3011_p5 }
 0x6d5   : > { %3021 = shalt.err (!%p3018_p12)
}
 0x6d6   : > { %2693 = dma.vmem_to_hbm [thread:$0]  (%p3946_p6), %s3777_s26, 128, %s3775_s17, %s2224_s10  }
 0x6d7 PF: > { %s3947_s30 = sld [smem:[#allocation25_spill]]  ;;  %s3948_s24 = sld [smem:[#allocation21_spill]] }
 0x6d8   : > { %s3949_s3 = sld [smem:[#allocation31_spill]] }
 0x6dd   : > { %p2716_p7 = scmp.ge.s32.totalorder %s3947_s30, 2  ;;  %s2249_s27 = sand.u32 1, %s3948_s24  }
 0x6de   : > { %p3950_p11 = scmp.ne.s32.totalorder %s3949_s3, 0  ;;  %s2250_s12 = scalar_lea.sflag [#allocation9], %s2249_s27 }
 0x6e0   : > { %p2710_p0 = pnand %p2716_p7, %p3950_p11 }
 0x6e2   : > { %3079 = dma.done.wait (!%p2710_p0), %s2250_s12, 128  }
 0x6e3   : > { %3081 = vsyncadd (!%p2710_p0), %s2250_s12, 4294967168  ;;  %s30_s18 = sadd.s32 1, %s3947_s30   ;;  %s3951_s25 = sld [smem:[#allocation19_spill]] }
 0x6e4   : > { %p27_p1 = scmp.ge.s32.totalorder %s30_s18, 6   ;;  %s3952_s26 = sld [smem:[#allocation20_spill]] }
 0x6e5   : > { %s3953_s27 = sld [smem:[#allocation28_spill]]  ;;  %s3954_s2 = sld [smem:[#allocation22_spill]] }
 0x6e6   : > { %s3955_s30 = sld [smem:[#allocation29_spill]]  ;;  %s3956_s14 = sld [smem:[#allocation23_spill]] }
 0x6e7   : > { %s3957_s15 = sld [smem:[#allocation24_spill]]  ;;  %s3958_s16 = sld [smem:[#allocation26_spill]] }
 0x6e8   : > { %s3959_s17 = sld [smem:[#allocation27_spill]]  ;;  %s3960_s28 = smov %s3100_s29 }
 0x6e9   :  { %29 = sbr.rel (!%p27_p1) target bundleno = 25 (0x19), region = 185 }
 0x6eb   : > { %s3961_s29 = smov %s3954_s2 }
 0x6f0   :  { %2255 = vsyncpa [#allocation8], 1 }
 0x6f1   :  { %2257 = vsyncpa [#allocation8 + $0x1], 1 }
 0x6f2   :  { %2258 = vsyncpa [#allocation11], 1 }
 0x6f3   :  { %2259 = vsyncpa [#allocation9], 1 }
 0x6f4   :  { %2261 = vsyncpa [#allocation9 + $0x1], 1 }

</bundles_post_ra>
